<compile_context>
chip_gen: v7x
topology: tpu7x:2x2x1
jax: 0.10.0
libtpu: 0.0.40
codegen_flags: <defaults>
</compile_context>

<pallas_src>
import functools

import jax
import jax.numpy as jnp
from jax.experimental import pallas as pl
from jax.experimental.pallas import tpu as pltpu


# ---------------------------------------------------------------------------
# tiling helpers
# ---------------------------------------------------------------------------

_VMEM_LIMIT_BYTES = 48 * 1024 * 1024   # < 64 MiB physical on v7x, safe on v5e/v6e
_ADJ_BUDGET_BYTES = 24 * 1024 * 1024   # double-buffered bf16 adjacency row slab
_EW_MAX_ROWS = 2048                    # row-tile cap for elementwise passes


def _round_up(x, m):
    return (x + m - 1) // m * m


def _pick_tile_rows(num_nodes):
    """Largest row tile (multiple of 8) whose double-buffered bf16 adjacency
    slab (2 * TM * N * 2B) stays well inside v7x's 64 MiB VMEM."""
    n8 = _round_up(max(num_nodes, 8), 8)
    tm = 512
    while tm > 8 and 2 * tm * n8 * 2 > _ADJ_BUDGET_BYTES:
        tm //= 2
    return min(tm, n8)


def _pick_ew_tile_rows(n_pad, tm):
    """Row tile for the mem-bound elementwise passes (encoder, BN+ReLU):
    the largest multiple of the conv tile that divides n_pad and stays
    under _EW_MAX_ROWS, so per-grid-step overhead is amortized."""
    nt = n_pad // tm
    k_max = max(1, min(nt, _EW_MAX_ROWS // tm))
    for k in range(k_max, 0, -1):
        if nt % k == 0:
            return tm * k
    return tm


def _compiler_params():
    return pltpu.CompilerParams(
        dimension_semantics=("parallel",),        # shard node tiles across TCs (v7x)
        vmem_limit_bytes=_VMEM_LIMIT_BYTES,
    )


# ---------------------------------------------------------------------------
# Pallas kernels
# ---------------------------------------------------------------------------

def _encoder_kernel(x_ref, w_ref, b_ref, o_ref):
    """Feature encoder tile: o = x @ W + b, stored in o_ref.dtype (bf16)."""
    y = jnp.dot(x_ref[...], w_ref[...], preferred_element_type=jnp.float32)
    o_ref[...] = (y + b_ref[...]).astype(o_ref.dtype)


def _gnn_conv_kernel(adj_ref, x_ref, esum_ref, w_ref, wew_ref, b_ref,
                     h_ref, stats_ref, *, tm, n_real):
    """One node-row tile of a GNN layer (pre-BN):
         agg = (A + I)[tile] @ x                  (bf16 x bf16 -> f32, MXU)
         h   = agg @ W + esum[tile] @ (We @ W) + b
       plus per-tile BatchNorm partial statistics (sum, sum of squares)."""
    agg = jnp.dot(adj_ref[...], x_ref[...], preferred_element_type=jnp.float32)
    h = jnp.dot(agg, w_ref[...], preferred_element_type=jnp.float32)
    h = h + jnp.dot(esum_ref[...], wew_ref[...],
                    preferred_element_type=jnp.float32)
    h = h + b_ref[...]
    h_ref[...] = h

    # single-pass sum / sumsq partials, masking zero-padded rows so the batch
    # statistics only count real nodes.
    dout = h.shape[1]
    row = pl.program_id(0) * tm + jax.lax.broadcasted_iota(jnp.int32, (tm, 1), 0)
    valid = (row < n_real).astype(jnp.float32)
    hv = h * valid
    s = jnp.sum(hv, axis=0, keepdims=True)          # (1, dout)
    sq = jnp.sum(hv * h, axis=0, keepdims=True)     # (1, dout)
    ridx = jax.lax.broadcasted_iota(jnp.int32, (8, dout), 0)
    stats = jnp.where(ridx == 0, jnp.broadcast_to(s, (8, dout)),
                      jnp.where(ridx == 1, jnp.broadcast_to(sq, (8, dout)), 0.0))
    stats_ref[...] = stats


def _bn_relu_kernel(h_ref, scale_ref, shift_ref, o_ref):
    """Apply precomputed BN affine (scale/shift) + ReLU, cast to out dtype."""
    y = jnp.maximum(h_ref[...] * scale_ref[...] + shift_ref[...], 0.0)
    o_ref[...] = y.astype(o_ref.dtype)


# ---------------------------------------------------------------------------
# pallas_call wrappers
# ---------------------------------------------------------------------------

def pallas_encoder(v, w, b, tm_rows, out_dtype=jnp.bfloat16):
    n_pad, raw = v.shape
    dout = w.shape[1]
    nt = n_pad // tm_rows
    return pl.pallas_call(
        _encoder_kernel,
        out_shape=jax.ShapeDtypeStruct((n_pad, dout), out_dtype),
        grid=(nt,),
        in_specs=[pl.BlockSpec((tm_rows, raw), lambda i: (i, 0)),
                  pl.BlockSpec((raw, dout), lambda i: (0, 0)),
                  pl.BlockSpec((1, dout), lambda i: (0, 0))],
        out_specs=pl.BlockSpec((tm_rows, dout), lambda i: (i, 0)),
        compiler_params=_compiler_params(),
    )(v, w, b)


def pallas_gnn_conv(adj, x, esum, w, wew, b, tm, n_real):
    n_pad = adj.shape[0]
    din = x.shape[1]
    de = esum.shape[1]
    dout = w.shape[1]
    nt = n_pad // tm
    kernel = functools.partial(_gnn_conv_kernel, tm=tm, n_real=n_real)
    return pl.pallas_call(
        kernel,
        out_shape=(jax.ShapeDtypeStruct((n_pad, dout), jnp.float32),
                   jax.ShapeDtypeStruct((nt * 8, dout), jnp.float32)),
        grid=(nt,),
        in_specs=[pl.BlockSpec((tm, n_pad), lambda i: (i, 0)),   # adjacency rows (bf16)
                  pl.BlockSpec((n_pad, din), lambda i: (0, 0)),  # x, VMEM-resident
                  pl.BlockSpec((tm, de), lambda i: (i, 0)),      # per-dst edge sums
                  pl.BlockSpec((din, dout), lambda i: (0, 0)),   # W
                  pl.BlockSpec((de, dout), lambda i: (0, 0)),    # We @ W (folded)
                  pl.BlockSpec((1, dout), lambda i: (0, 0))],    # bias
        out_specs=(pl.BlockSpec((tm, dout), lambda i: (i, 0)),
                   pl.BlockSpec((8, dout), lambda i: (i, 0))),
        compiler_params=_compiler_params(),
    )(adj, x, esum, w, wew, b)


def pallas_bn_relu(h, scale, shift, tm_rows, out_dtype):
    n_pad, dout = h.shape
    nt = n_pad // tm_rows
    return pl.pallas_call(
        _bn_relu_kernel,
        out_shape=jax.ShapeDtypeStruct((n_pad, dout), out_dtype),
        grid=(nt,),
        in_specs=[pl.BlockSpec((tm_rows, dout), lambda i: (i, 0)),
                  pl.BlockSpec((1, dout), lambda i: (0, 0)),
                  pl.BlockSpec((1, dout), lambda i: (0, 0))],
        out_specs=pl.BlockSpec((tm_rows, dout), lambda i: (i, 0)),
        compiler_params=_compiler_params(),
    )(h, scale, shift)


# ---------------------------------------------------------------------------
# GNNnetwork forward (glue in plain JAX, compute in Pallas)
# ---------------------------------------------------------------------------

def init_params(key, num_layers, raw_dim, in_dim, emb_dim, edge_dim):
    keys = jax.random.split(key, 2 + 3 * num_layers)
    params = {
        "enc_w": jax.random.normal(keys[0], (raw_dim, in_dim), jnp.float32) * 0.1,
        "enc_b": jax.random.normal(keys[1], (1, in_dim), jnp.float32) * 0.1,
        "layers": [],
    }
    for i in range(num_layers):
        din = in_dim if i == 0 else emb_dim
        k_we, k_w, k_b = keys[2 + 3 * i: 5 + 3 * i]
        params["layers"].append({
            "we": jax.random.normal(k_we, (edge_dim, din), jnp.float32) * 0.1,
            "w": jax.random.normal(k_w, (din, emb_dim), jnp.float32) * 0.1,
            "b": jax.random.normal(k_b, (1, emb_dim), jnp.float32) * 0.1,
            "gamma": jnp.ones((emb_dim,), jnp.float32),
            "beta": jnp.zeros((emb_dim,), jnp.float32),
        })
    return params


@functools.partial(jax.jit, static_argnames=("num_nodes",))
def gnn_network_forward(params, v_features, flat_edge_index, e_features,
                        num_nodes):
    num_layers = len(params["layers"])
    tm = _pick_tile_rows(num_nodes)
    n_pad = _round_up(max(num_nodes, 8), tm)
    tm_ew = _pick_ew_tile_rows(n_pad, tm)          # bigger tile for elementwise passes

    # --- glue: sparse scatter of edges into dense operands -----------------
    # TODO(synk): replace the dense O(N^2) adjacency with a CSR neighbor-list
    # gather (PrefetchScalarGridSpec) for genuinely sparse / large graphs.
    src = flat_edge_index[0]
    dst = flat_edge_index[1]
    adj = jnp.zeros((n_pad, n_pad), jnp.float32).at[dst, src].add(1.0)
    diag = jnp.arange(n_pad)
    adj = adj.at[diag, diag].add(1.0)              # fold the +x self term (A + I)
    adj = adj.astype(jnp.bfloat16)                 # 0/1/small counts: exact in bf16
    edge_sum = jax.ops.segment_sum(e_features, dst, num_segments=n_pad)

    v_pad = jnp.zeros((n_pad, v_features.shape[1]), v_features.dtype)
    v_pad = v_pad.at[:num_nodes].set(v_features)

    # --- feature encoder (tiled Pallas matmul, bf16 activations out) -------
    x = pallas_encoder(v_pad, params["enc_w"], params["enc_b"], tm_ew)

    # --- GNN layers: conv + partial BN stats, then BN+ReLU, all tiled ------
    for li, lp in enumerate(params["layers"]):
        wew = lp["we"] @ lp["w"]                   # fold edge projection (tiny)
        h, stats = pallas_gnn_conv(adj, x, edge_sum, lp["w"], wew, lp["b"],
                                   tm, num_nodes)
        # finalize BatchNorm batch statistics: tiny [emb_dim] math in glue
        tot = stats.reshape(-1, 8, stats.shape[-1]).sum(axis=0)
        mean = tot[0] / num_nodes
        var = tot[1] / num_nodes - mean * mean     # biased var (training-mode BN)
        inv = jax.lax.rsqrt(var + 1e-5)
        scale = (lp["gamma"] * inv)[None, :]
        shift = (lp["beta"] - mean * lp["gamma"] * inv)[None, :]
        out_dtype = jnp.float32 if li == num_layers - 1 else jnp.bfloat16
        x = pallas_bn_relu(h, scale, shift, tm_ew, out_dtype)

    return x[:num_nodes]


# ---------------------------------------------------------------------------
# Demo
# ---------------------------------------------------------------------------

if __name__ == "__main__":
    # small but lane-dense (feature dims multiple of 128) shapes
    NUM_LAYERS = 3
    N_NODES = 256       # nodes
    N_EDGES = 1024      # edges
    RAW_DIM = 16        # raw vertex feature dim (feature_encoder input)
    IN_DIM = 128        # encoder output / first conv input
    EMB_DIM = 128       # hidden / output dim
    EDGE_DIM = 8        # edge feature dim

    key = jax.random.PRNGKey(0)
    k_x, k_src, k_dst, k_e, k_p = jax.random.split(key, 5)

    v_features = jax.random.normal(k_x, (N_NODES, RAW_DIM), jnp.float32)
    src = jax.random.randint(k_src, (N_EDGES,), 0, N_NODES, jnp.int32)
    dst = jax.random.randint(k_dst, (N_EDGES,), 0, N_NODES, jnp.int32)
    flat_edge_index = jnp.stack([src, dst], axis=0)              # [2, E]
    e_features = jax.random.normal(k_e, (N_EDGES, EDGE_DIM), jnp.float32)

    params = init_params(k_p, NUM_LAYERS, RAW_DIM, IN_DIM, EMB_DIM, EDGE_DIM)

    out = gnn_network_forward(params, v_features, flat_edge_index, e_features,
                              num_nodes=N_NODES)
    out = jax.block_until_ready(out)

    assert out.shape == (N_NODES, EMB_DIM)
    assert bool(jnp.all(jnp.isfinite(out)))
    assert bool(jnp.all(out >= 0.0))  # ReLU output
    print("KERNEL_OK")
</pallas_src>

<mosaic_0001>
module attributes {stable_mosaic.version = 11 : i64} {
  func.func private @main(%arg0: i32) attributes {dimension_semantics = [#tpu.dimension_semantics<core_parallel>], iteration_bounds = array<i64: 2>, tpu.core_type = #tpu.core_type<sc_scalar_subcore>, window_params = []} {
    return
  }
}

module attributes {stable_mosaic.version = 11 : i64} {
  func.func private @main(%arg0: i32) attributes {dimension_semantics = [#tpu.dimension_semantics<core_parallel>], iteration_bounds = array<i64: 2>, tpu.core_type = #tpu.core_type<sc_scalar_subcore>, window_params = []} {
    return
  }
}

module attributes {stable_mosaic.version = 11 : i64} {
  func.func @_encoder_kernel(%arg0: i32, %arg1: memref<256x16xf32, #tpu.memory_space<vmem>>, %arg2: memref<16x128xf32, #tpu.memory_space<vmem>>, %arg3: memref<1x128xf32, #tpu.memory_space<vmem>>, %arg4: memref<256x128xbf16, #tpu.memory_space<vmem>>) attributes {dimension_semantics = [#tpu.dimension_semantics<parallel>], iteration_bounds = array<i64: 1>, scalar_prefetch = 0 : i64, scratch_operands = 0 : i64, tpu.core_type = #tpu.core_type<tc>, window_params = [{transform_indices = @transform_0, window_bounds = array<i64: 256, 16>}, {pipeline_mode = #tpu.pipeline_mode<synchronous>, transform_indices = @transform_1, window_bounds = array<i64: 16, 128>}, {pipeline_mode = #tpu.pipeline_mode<synchronous>, transform_indices = @transform_2, window_bounds = array<i64: 1, 128>}, {transform_indices = @transform_3, window_bounds = array<i64: 256, 128>}]} {
    %c0 = arith.constant 0 : index
    %c0_0 = arith.constant 0 : index
    %0 = vector.load %arg1[%c0, %c0_0] : memref<256x16xf32, #tpu.memory_space<vmem>>, vector<256x16xf32>
    %c0_1 = arith.constant 0 : index
    %c0_2 = arith.constant 0 : index
    %1 = vector.load %arg2[%c0_1, %c0_2] : memref<16x128xf32, #tpu.memory_space<vmem>>, vector<16x128xf32>
    %cst = arith.constant dense<0.000000e+00> : vector<256x128xf32>
    %2 = tpu.matmul %0, %1, %cst {dimension_numbers = #tpu.dot_dimension_numbers<[1], [0], [0], [1], [0, 0, 1, 1], [], []>} : vector<256x16xf32>, vector<16x128xf32>, vector<256x128xf32> -> vector<256x128xf32>
    %c0_3 = arith.constant 0 : index
    %c0_4 = arith.constant 0 : index
    %3 = vector.load %arg3[%c0_3, %c0_4] : memref<1x128xf32, #tpu.memory_space<vmem>>, vector<1x128xf32>
    %4 = vector.broadcast %3 : vector<1x128xf32> to vector<256x128xf32>
    %5 = arith.addf %2, %4 : vector<256x128xf32>
    %6 = arith.truncf %5 : vector<256x128xf32> to vector<256x128xbf16>
    %c0_5 = arith.constant 0 : index
    %c0_6 = arith.constant 0 : index
    %7 = vector.load %arg4[%c0_5, %c0_6] : memref<256x128xbf16, #tpu.memory_space<vmem>>, vector<256x128xbf16>
    tpu.vector_store %arg4[%c0_5, %c0_6], %6 {strides = array<i32>} : memref<256x128xbf16, #tpu.memory_space<vmem>>, vector<256x128xbf16>,
    return
  }
  func.func @transform_0(%arg0: i32) -> (i32, i32) {
    %c0_i32 = arith.constant 0 : i32
    %c0_i32_0 = arith.constant 0 : i32
    return %arg0, %c0_i32 : i32, i32
  }
  func.func @transform_1(%arg0: i32) -> (i32, i32) {
    %c0_i32 = arith.constant 0 : i32
    %c0_i32_0 = arith.constant 0 : i32
    %c0_i32_1 = arith.constant 0 : i32
    return %c0_i32, %c0_i32_0 : i32, i32
  }
  func.func @transform_2(%arg0: i32) -> (i32, i32) {
    %c0_i32 = arith.constant 0 : i32
    %c0_i32_0 = arith.constant 0 : i32
    %c0_i32_1 = arith.constant 0 : i32
    return %c0_i32, %c0_i32_0 : i32, i32
  }
  func.func @transform_3(%arg0: i32) -> (i32, i32) {
    %c0_i32 = arith.constant 0 : i32
    %c0_i32_0 = arith.constant 0 : i32
    return %arg0, %c0_i32 : i32, i32
  }
}

module attributes {stable_mosaic.version = 11 : i64} {
  func.func @_gnn_conv_kernel(%arg0: i32, %arg1: memref<256x256xbf16, #tpu.memory_space<vmem>>, %arg2: memref<256x128xbf16, #tpu.memory_space<vmem>>, %arg3: memref<256x8xf32, #tpu.memory_space<vmem>>, %arg4: memref<128x128xf32, #tpu.memory_space<vmem>>, %arg5: memref<8x128xf32, #tpu.memory_space<vmem>>, %arg6: memref<1x128xf32, #tpu.memory_space<vmem>>, %arg7: memref<256x128xf32, #tpu.memory_space<vmem>>, %arg8: memref<8x128xf32, #tpu.memory_space<vmem>>) attributes {dimension_semantics = [#tpu.dimension_semantics<parallel>], iteration_bounds = array<i64: 1>, scalar_prefetch = 0 : i64, scratch_operands = 0 : i64, tpu.core_type = #tpu.core_type<tc>, window_params = [{transform_indices = @transform_0, window_bounds = array<i64: 256, 256>}, {pipeline_mode = #tpu.pipeline_mode<synchronous>, transform_indices = @transform_1, window_bounds = array<i64: 256, 128>}, {transform_indices = @transform_2, window_bounds = array<i64: 256, 8>}, {pipeline_mode = #tpu.pipeline_mode<synchronous>, transform_indices = @transform_3, window_bounds = array<i64: 128, 128>}, {pipeline_mode = #tpu.pipeline_mode<synchronous>, transform_indices = @transform_4, window_bounds = array<i64: 8, 128>}, {pipeline_mode = #tpu.pipeline_mode<synchronous>, transform_indices = @transform_5, window_bounds = array<i64: 1, 128>}, {transform_indices = @transform_6, window_bounds = array<i64: 256, 128>}, {transform_indices = @transform_7, window_bounds = array<i64: 8, 128>}]} {
    %c0 = arith.constant 0 : index
    %c0_0 = arith.constant 0 : index
    %0 = vector.load %arg1[%c0, %c0_0] : memref<256x256xbf16, #tpu.memory_space<vmem>>, vector<256x256xbf16>
    %c0_1 = arith.constant 0 : index
    %c0_2 = arith.constant 0 : index
    %1 = vector.load %arg2[%c0_1, %c0_2] : memref<256x128xbf16, #tpu.memory_space<vmem>>, vector<256x128xbf16>
    %cst = arith.constant dense<0.000000e+00> : vector<256x128xf32>
    %2 = tpu.matmul %0, %1, %cst {dimension_numbers = #tpu.dot_dimension_numbers<[1], [0], [0], [1], [0, 0, 1, 1], [], []>} : vector<256x256xbf16>, vector<256x128xbf16>, vector<256x128xf32> -> vector<256x128xf32>
    %c0_3 = arith.constant 0 : index
    %c0_4 = arith.constant 0 : index
    %3 = vector.load %arg4[%c0_3, %c0_4] : memref<128x128xf32, #tpu.memory_space<vmem>>, vector<128x128xf32>
    %cst_5 = arith.constant dense<0.000000e+00> : vector<256x128xf32>
    %4 = tpu.matmul %2, %3, %cst_5 {dimension_numbers = #tpu.dot_dimension_numbers<[1], [0], [0], [1], [0, 0, 1, 1], [], []>} : vector<256x128xf32>, vector<128x128xf32>, vector<256x128xf32> -> vector<256x128xf32>
    %c0_6 = arith.constant 0 : index
    %c0_7 = arith.constant 0 : index
    %5 = vector.load %arg3[%c0_6, %c0_7] : memref<256x8xf32, #tpu.memory_space<vmem>>, vector<256x8xf32>
    %c0_8 = arith.constant 0 : index
    %c0_9 = arith.constant 0 : index
    %6 = vector.load %arg5[%c0_8, %c0_9] : memref<8x128xf32, #tpu.memory_space<vmem>>, vector<8x128xf32>
    %cst_10 = arith.constant dense<0.000000e+00> : vector<256x128xf32>
    %7 = tpu.matmul %5, %6, %cst_10 {dimension_numbers = #tpu.dot_dimension_numbers<[1], [0], [0], [1], [0, 0, 1, 1], [], []>} : vector<256x8xf32>, vector<8x128xf32>, vector<256x128xf32> -> vector<256x128xf32>
    %8 = arith.addf %4, %7 : vector<256x128xf32>
    %c0_11 = arith.constant 0 : index
    %c0_12 = arith.constant 0 : index
    %9 = vector.load %arg6[%c0_11, %c0_12] : memref<1x128xf32, #tpu.memory_space<vmem>>, vector<1x128xf32>
    %10 = vector.broadcast %9 : vector<1x128xf32> to vector<256x128xf32>
    %11 = arith.addf %8, %10 : vector<256x128xf32>
    %c0_13 = arith.constant 0 : index
    %c0_14 = arith.constant 0 : index
    %12 = vector.load %arg7[%c0_13, %c0_14] : memref<256x128xf32, #tpu.memory_space<vmem>>, vector<256x128xf32>
    tpu.vector_store %arg7[%c0_13, %c0_14], %11 {strides = array<i32>} : memref<256x128xf32, #tpu.memory_space<vmem>>, vector<256x128xf32>,
    %c256_i32 = arith.constant 256 : i32
    %13 = arith.muli %arg0, %c256_i32 : i32
    %14 = tpu.iota {dimensions = array<i32: 0>} : vector<256x1xi32>
    %15 = vector.broadcast %13 : i32 to vector<256x1xi32>
    %16 = arith.addi %15, %14 : vector<256x1xi32>
    %c256_i32_15 = arith.constant 256 : i32
    %17 = vector.broadcast %c256_i32_15 : i32 to vector<256x1xi32>
    %18 = arith.cmpi slt, %16, %17 : vector<256x1xi32>
    %19 = arith.extui %18 : vector<256x1xi1> to vector<256x1xi32>
    %20 = arith.sitofp %19 : vector<256x1xi32> to vector<256x1xf32>
    %21 = vector.broadcast %20 : vector<256x1xf32> to vector<256x128xf32>
    %22 = arith.mulf %11, %21 : vector<256x128xf32>
    %cst_16 = arith.constant dense<0.000000e+00> : vector<128xf32>
    %23 = vector.multi_reduction <add>, %22, %cst_16 [0] : vector<256x128xf32> to vector<128xf32>
    %24 = vector.shape_cast %23 : vector<128xf32> to vector<1x128xf32>
    %25 = arith.mulf %22, %11 : vector<256x128xf32>
    %cst_17 = arith.constant dense<0.000000e+00> : vector<128xf32>
    %26 = vector.multi_reduction <add>, %25, %cst_17 [0] : vector<256x128xf32> to vector<128xf32>
    %27 = vector.shape_cast %26 : vector<128xf32> to vector<1x128xf32>
    %28 = tpu.iota {dimensions = array<i32: 0>} : vector<8x128xi32>
    %c0_i32 = arith.constant 0 : i32
    %29 = vector.broadcast %c0_i32 : i32 to vector<8x128xi32>
    %30 = arith.cmpi eq, %28, %29 : vector<8x128xi32>
    %31 = vector.shape_cast %24 : vector<1x128xf32> to vector<1x128xf32>
    %32 = vector.broadcast %31 : vector<1x128xf32> to vector<8x128xf32>
    %c1_i32 = arith.constant 1 : i32
    %33 = vector.broadcast %c1_i32 : i32 to vector<8x128xi32>
    %34 = arith.cmpi eq, %28, %33 : vector<8x128xi32>
    %35 = vector.shape_cast %27 : vector<1x128xf32> to vector<1x128xf32>
    %36 = vector.broadcast %35 : vector<1x128xf32> to vector<8x128xf32>
    %cst_18 = arith.constant 0.000000e+00 : f32
    %37 = vector.broadcast %cst_18 : f32 to vector<8x128xf32>
    %38 = arith.select %34, %36, %37 : vector<8x128xi1>, vector<8x128xf32>
    %39 = arith.select %30, %32, %38 : vector<8x128xi1>, vector<8x128xf32>
    %c0_19 = arith.constant 0 : index
    %c0_20 = arith.constant 0 : index
    %40 = vector.load %arg8[%c0_19, %c0_20] : memref<8x128xf32, #tpu.memory_space<vmem>>, vector<8x128xf32>
    tpu.vector_store %arg8[%c0_19, %c0_20], %39 {strides = array<i32>} : memref<8x128xf32, #tpu.memory_space<vmem>>, vector<8x128xf32>,
    return
  }
  func.func @transform_0(%arg0: i32) -> (i32, i32) {
    %c0_i32 = arith.constant 0 : i32
    %c0_i32_0 = arith.constant 0 : i32
    return %arg0, %c0_i32 : i32, i32
  }
  func.func @transform_1(%arg0: i32) -> (i32, i32) {
    %c0_i32 = arith.constant 0 : i32
    %c0_i32_0 = arith.constant 0 : i32
    %c0_i32_1 = arith.constant 0 : i32
    return %c0_i32, %c0_i32_0 : i32, i32
  }
  func.func @transform_2(%arg0: i32) -> (i32, i32) {
    %c0_i32 = arith.constant 0 : i32
    %c0_i32_0 = arith.constant 0 : i32
    return %arg0, %c0_i32 : i32, i32
  }
  func.func @transform_3(%arg0: i32) -> (i32, i32) {
    %c0_i32 = arith.constant 0 : i32
    %c0_i32_0 = arith.constant 0 : i32
    %c0_i32_1 = arith.constant 0 : i32
    return %c0_i32, %c0_i32_0 : i32, i32
  }
  func.func @transform_4(%arg0: i32) -> (i32, i32) {
    %c0_i32 = arith.constant 0 : i32
    %c0_i32_0 = arith.constant 0 : i32
    %c0_i32_1 = arith.constant 0 : i32
    return %c0_i32, %c0_i32_0 : i32, i32
  }
  func.func @transform_5(%arg0: i32) -> (i32, i32) {
    %c0_i32 = arith.constant 0 : i32
    %c0_i32_0 = arith.constant 0 : i32
    %c0_i32_1 = arith.constant 0 : i32
    return %c0_i32, %c0_i32_0 : i32, i32
  }
  func.func @transform_6(%arg0: i32) -> (i32, i32) {
    %c0_i32 = arith.constant 0 : i32
    %c0_i32_0 = arith.constant 0 : i32
    return %arg0, %c0_i32 : i32, i32
  }
  func.func @transform_7(%arg0: i32) -> (i32, i32) {
    %c0_i32 = arith.constant 0 : i32
    %c0_i32_0 = arith.constant 0 : i32
    return %arg0, %c0_i32 : i32, i32
  }
}

module attributes {stable_mosaic.version = 11 : i64} {
  func.func @_bn_relu_kernel(%arg0: i32, %arg1: memref<256x128xf32, #tpu.memory_space<vmem>>, %arg2: memref<1x128xf32, #tpu.memory_space<vmem>>, %arg3: memref<1x128xf32, #tpu.memory_space<vmem>>, %arg4: memref<256x128xbf16, #tpu.memory_space<vmem>>) attributes {dimension_semantics = [#tpu.dimension_semantics<parallel>], iteration_bounds = array<i64: 1>, scalar_prefetch = 0 : i64, scratch_operands = 0 : i64, tpu.core_type = #tpu.core_type<tc>, window_params = [{transform_indices = @transform_0, window_bounds = array<i64: 256, 128>}, {pipeline_mode = #tpu.pipeline_mode<synchronous>, transform_indices = @transform_1, window_bounds = array<i64: 1, 128>}, {pipeline_mode = #tpu.pipeline_mode<synchronous>, transform_indices = @transform_2, window_bounds = array<i64: 1, 128>}, {transform_indices = @transform_3, window_bounds = array<i64: 256, 128>}]} {
    %c0 = arith.constant 0 : index
    %c0_0 = arith.constant 0 : index
    %0 = vector.load %arg1[%c0, %c0_0] : memref<256x128xf32, #tpu.memory_space<vmem>>, vector<256x128xf32>
    %c0_1 = arith.constant 0 : index
    %c0_2 = arith.constant 0 : index
    %1 = vector.load %arg2[%c0_1, %c0_2] : memref<1x128xf32, #tpu.memory_space<vmem>>, vector<1x128xf32>
    %2 = vector.broadcast %1 : vector<1x128xf32> to vector<256x128xf32>
    %3 = arith.mulf %0, %2 : vector<256x128xf32>
    %c0_3 = arith.constant 0 : index
    %c0_4 = arith.constant 0 : index
    %4 = vector.load %arg3[%c0_3, %c0_4] : memref<1x128xf32, #tpu.memory_space<vmem>>, vector<1x128xf32>
    %5 = vector.broadcast %4 : vector<1x128xf32> to vector<256x128xf32>
    %6 = arith.addf %3, %5 : vector<256x128xf32>
    %cst = arith.constant 0.000000e+00 : f32
    %7 = vector.broadcast %cst : f32 to vector<256x128xf32>
    %8 = arith.maximumf %6, %7 : vector<256x128xf32>
    %9 = arith.truncf %8 : vector<256x128xf32> to vector<256x128xbf16>
    %c0_5 = arith.constant 0 : index
    %c0_6 = arith.constant 0 : index
    %10 = vector.load %arg4[%c0_5, %c0_6] : memref<256x128xbf16, #tpu.memory_space<vmem>>, vector<256x128xbf16>
    tpu.vector_store %arg4[%c0_5, %c0_6], %9 {strides = array<i32>} : memref<256x128xbf16, #tpu.memory_space<vmem>>, vector<256x128xbf16>,
    return
  }
  func.func @transform_0(%arg0: i32) -> (i32, i32) {
    %c0_i32 = arith.constant 0 : i32
    %c0_i32_0 = arith.constant 0 : i32
    return %arg0, %c0_i32 : i32, i32
  }
  func.func @transform_1(%arg0: i32) -> (i32, i32) {
    %c0_i32 = arith.constant 0 : i32
    %c0_i32_0 = arith.constant 0 : i32
    %c0_i32_1 = arith.constant 0 : i32
    return %c0_i32, %c0_i32_0 : i32, i32
  }
  func.func @transform_2(%arg0: i32) -> (i32, i32) {
    %c0_i32 = arith.constant 0 : i32
    %c0_i32_0 = arith.constant 0 : i32
    %c0_i32_1 = arith.constant 0 : i32
    return %c0_i32, %c0_i32_0 : i32, i32
  }
  func.func @transform_3(%arg0: i32) -> (i32, i32) {
    %c0_i32 = arith.constant 0 : i32
    %c0_i32_0 = arith.constant 0 : i32
    return %arg0, %c0_i32 : i32, i32
  }
}

module attributes {stable_mosaic.version = 11 : i64} {
  func.func @_bn_relu_kernel(%arg0: i32, %arg1: memref<256x128xf32, #tpu.memory_space<vmem>>, %arg2: memref<1x128xf32, #tpu.memory_space<vmem>>, %arg3: memref<1x128xf32, #tpu.memory_space<vmem>>, %arg4: memref<256x128xf32, #tpu.memory_space<vmem>>) attributes {dimension_semantics = [#tpu.dimension_semantics<parallel>], iteration_bounds = array<i64: 1>, scalar_prefetch = 0 : i64, scratch_operands = 0 : i64, tpu.core_type = #tpu.core_type<tc>, window_params = [{transform_indices = @transform_0, window_bounds = array<i64: 256, 128>}, {pipeline_mode = #tpu.pipeline_mode<synchronous>, transform_indices = @transform_1, window_bounds = array<i64: 1, 128>}, {pipeline_mode = #tpu.pipeline_mode<synchronous>, transform_indices = @transform_2, window_bounds = array<i64: 1, 128>}, {transform_indices = @transform_3, window_bounds = array<i64: 256, 128>}]} {
    %c0 = arith.constant 0 : index
    %c0_0 = arith.constant 0 : index
    %0 = vector.load %arg1[%c0, %c0_0] : memref<256x128xf32, #tpu.memory_space<vmem>>, vector<256x128xf32>
    %c0_1 = arith.constant 0 : index
    %c0_2 = arith.constant 0 : index
    %1 = vector.load %arg2[%c0_1, %c0_2] : memref<1x128xf32, #tpu.memory_space<vmem>>, vector<1x128xf32>
    %2 = vector.broadcast %1 : vector<1x128xf32> to vector<256x128xf32>
    %3 = arith.mulf %0, %2 : vector<256x128xf32>
    %c0_3 = arith.constant 0 : index
    %c0_4 = arith.constant 0 : index
    %4 = vector.load %arg3[%c0_3, %c0_4] : memref<1x128xf32, #tpu.memory_space<vmem>>, vector<1x128xf32>
    %5 = vector.broadcast %4 : vector<1x128xf32> to vector<256x128xf32>
    %6 = arith.addf %3, %5 : vector<256x128xf32>
    %cst = arith.constant 0.000000e+00 : f32
    %7 = vector.broadcast %cst : f32 to vector<256x128xf32>
    %8 = arith.maximumf %6, %7 : vector<256x128xf32>
    %c0_5 = arith.constant 0 : index
    %c0_6 = arith.constant 0 : index
    %9 = vector.load %arg4[%c0_5, %c0_6] : memref<256x128xf32, #tpu.memory_space<vmem>>, vector<256x128xf32>
    tpu.vector_store %arg4[%c0_5, %c0_6], %8 {strides = array<i32>} : memref<256x128xf32, #tpu.memory_space<vmem>>, vector<256x128xf32>,
    return
  }
  func.func @transform_0(%arg0: i32) -> (i32, i32) {
    %c0_i32 = arith.constant 0 : i32
    %c0_i32_0 = arith.constant 0 : i32
    return %arg0, %c0_i32 : i32, i32
  }
  func.func @transform_1(%arg0: i32) -> (i32, i32) {
    %c0_i32 = arith.constant 0 : i32
    %c0_i32_0 = arith.constant 0 : i32
    %c0_i32_1 = arith.constant 0 : i32
    return %c0_i32, %c0_i32_0 : i32, i32
  }
  func.func @transform_2(%arg0: i32) -> (i32, i32) {
    %c0_i32 = arith.constant 0 : i32
    %c0_i32_0 = arith.constant 0 : i32
    %c0_i32_1 = arith.constant 0 : i32
    return %c0_i32, %c0_i32_0 : i32, i32
  }
  func.func @transform_3(%arg0: i32) -> (i32, i32) {
    %c0_i32 = arith.constant 0 : i32
    %c0_i32_0 = arith.constant 0 : i32
    return %arg0, %c0_i32 : i32, i32
  }
}

</mosaic_0001>

<bundles_post_ra>
// kernel: gnn_network_forward.7
= control target key start
LH: loop header
LB: loop body
LE: loop exit
PB: predicated region body
PF: predicated region fallthrough
CT: control target
= control target key end

     0   :  { %vm55_vm0 = vcmask 130048   ;;  %s1064_s1 = inlined_call_operand.vmem [shape: f32[16,128], index: 1, kind: input, shape index: {}]   ;;  %s1065_s0 = inlined_call_operand.vmem [shape: f32[256,16], index: 0, kind: input, shape index: {}]   ;;  %s1066_s2 = inlined_call_operand.vmem [shape: f32[1,128], index: 2, kind: input, shape index: {}]   ;;  %s1067_s3 = inlined_call_operand.vmem [shape: bf16[256,128], index: 3, kind: output, shape index: {}]  }
   0x1   :  { %v46_v0 = vld [vmem:[%s1064_s1] sm:$0xff]  ;;  %v47_v1 = vld [vmem:[%s1064_s1 + $0x8] sm:$0xff]  ;;  %v16_v7 = vld [vmem:[%s1065_s0 + $0x10] sm:$0xff] }
   0x2   :  { %v14_v2 = vld [vmem:[%s1065_s0] sm:$0xff]  ;;  %v819_v3 = vpack.c.bf16 %v47_v1, %v46_v0  ;;  %v15_v5 = vld [vmem:[%s1065_s0 + $0x8] sm:$0xff]  ;;  %v32_v8 = vld [vmem:[%s1065_s0 + $0x90] sm:$0xff] }
   0x3   :  { %771 = vmatprep.mubr.msk.f32.mxu0 %vm55_vm0, %v14_v2  ;;  %v30_v4 = vld [vmem:[%s1065_s0 + $0x80] sm:$0xff]  ;;  %v31_v6 = vld [vmem:[%s1065_s0 + $0x88] sm:$0xff]  ;;  %v17_v9 = vld [vmem:[%s1065_s0 + $0x18] sm:$0xff] }
   0x4   :  { %795 = vmatprep.mubr.msk.f32.mxu1 %vm55_vm0, %v30_v4  ;;  %820 = vmatprep.subr.bf16.mxu0 %v819_v3  ;;  %v33_v10 = vld [vmem:[%s1065_s0 + $0x98] sm:$0xff]  ;;  %v18_v11 = vld [vmem:[%s1065_s0 + $0x20] sm:$0xff]  ;;  %v19_v13 = vld [vmem:[%s1065_s0 + $0x28] sm:$0xff] }
   0x5   :  { %823 = vmatprep.subr.bf16.mxu1 %v819_v3  ;;  %822 = vmatpush3.bf16.msra.mxu0 %v819_v3  ;;  %v34_v12 = vld [vmem:[%s1065_s0 + $0xa0] sm:$0xff]  ;;  %v35_v14 = vld [vmem:[%s1065_s0 + $0xa8] sm:$0xff]  ;;  %v20_v15 = vld [vmem:[%s1065_s0 + $0x30] sm:$0xff] }
   0x6   :  { %824 = vmatpush3.bf16.msra.mxu1 %v819_v3  ;;  %v36_v16 = vld [vmem:[%s1065_s0 + $0xb0] sm:$0xff]  ;;  %v21_v17 = vld [vmem:[%s1065_s0 + $0x38] sm:$0xff]  ;;  %v22_v19 = vld [vmem:[%s1065_s0 + $0x40] sm:$0xff] }
   0x7   :  { %v37_v18 = vld [vmem:[%s1065_s0 + $0xb8] sm:$0xff]  ;;  %v38_v20 = vld [vmem:[%s1065_s0 + $0xc0] sm:$0xff]  ;;  %v23_v21 = vld [vmem:[%s1065_s0 + $0x48] sm:$0xff] }
   0x8   :  { %772 = vmatmul.mubr.msk.f32.vlgmr.msra.gmra.mrb[0].mxu0 %vm55_vm0, %v15_v5  ;;  %v39_v22 = vld [vmem:[%s1065_s0 + $0xc8] sm:$0xff]  ;;  %v24_v23 = vld [vmem:[%s1065_s0 + $0x50] sm:$0xff]  ;;  %v25_v25 = vld [vmem:[%s1065_s0 + $0x58] sm:$0xff] }
   0x9   :  { %796 = vmatmul.mubr.msk.f32.vlgmr.msra.gmra.mrb[0].mxu1 %vm55_vm0, %v31_v6  ;;  %774 = vmatprep.mubr.msk.f32.mxu0 %vm55_vm0, %v16_v7  ;;  %v40_v24 = vld [vmem:[%s1065_s0 + $0xd0] sm:$0xff]  ;;  %v41_v26 = vld [vmem:[%s1065_s0 + $0xd8] sm:$0xff]  ;;  %v26_v27 = vld [vmem:[%s1065_s0 + $0x60] sm:$0xff] }
   0xa   :  { %798 = vmatprep.mubr.msk.f32.mxu1 %vm55_vm0, %v32_v8  ;;  %v42_v28 = vld [vmem:[%s1065_s0 + $0xe0] sm:$0xff]  ;;  %v27_v29 = vld [vmem:[%s1065_s0 + $0x68] sm:$0xff]  ;;  %v28_v31 = vld [vmem:[%s1065_s0 + $0x70] sm:$0xff] }
   0xb   :  { %v43_v30 = vld [vmem:[%s1065_s0 + $0xe8] sm:$0xff]  ;;  %v44_v32 = vld [vmem:[%s1065_s0 + $0xf0] sm:$0xff]  ;;  %v29_v33 = vld [vmem:[%s1065_s0 + $0x78] sm:$0xff] }
   0xc   :  { %775 = vmatmul.mubr.msk.f32.gmra.mrb[2].mxu0 %vm55_vm0, %v17_v9  ;;  %v45_v34 = vld [vmem:[%s1065_s0 + $0xf8] sm:$0xff]  ;;  %v982_v35 = vld [vmem:[%s1066_s2] ss:$0 sm:$0xff] }
   0xd   :  { %799 = vmatmul.mubr.msk.f32.gmra.mrb[2].mxu1 %vm55_vm0, %v33_v10  ;;  %777 = vmatprep.mubr.msk.f32.mxu0 %vm55_vm0, %v18_v11 }
   0xe   :  { %801 = vmatprep.mubr.msk.f32.mxu1 %vm55_vm0, %v34_v12 }
  0x10   :  { %778 = vmatmul.mubr.msk.f32.gmra.mrb[4].mxu0 %vm55_vm0, %v19_v13 }
  0x11   :  { %802 = vmatmul.mubr.msk.f32.gmra.mrb[4].mxu1 %vm55_vm0, %v35_v14  ;;  %780 = vmatprep.mubr.msk.f32.mxu0 %vm55_vm0, %v20_v15 }
  0x12   :  { %804 = vmatprep.mubr.msk.f32.mxu1 %vm55_vm0, %v36_v16 }
  0x14   :  { %781 = vmatmul.mubr.msk.f32.gmra.mrb[6].mxu0 %vm55_vm0, %v21_v17 }
  0x15   :  { %805 = vmatmul.mubr.msk.f32.gmra.mrb[6].mxu1 %vm55_vm0, %v37_v18  ;;  %783 = vmatprep.mubr.msk.f32.mxu0 %vm55_vm0, %v22_v19 }
  0x16   :  { %807 = vmatprep.mubr.msk.f32.mxu1 %vm55_vm0, %v38_v20 }
  0x18   :  { %784 = vmatmul.mubr.msk.f32.gmra.mrb[8].mxu0 %vm55_vm0, %v23_v21 }
  0x19   :  { %808 = vmatmul.mubr.msk.f32.gmra.mrb[8].mxu1 %vm55_vm0, %v39_v22  ;;  %786 = vmatprep.mubr.msk.f32.mxu0 %vm55_vm0, %v24_v23 }
  0x1a   :  { %810 = vmatprep.mubr.msk.f32.mxu1 %vm55_vm0, %v40_v24 }
  0x1c   :  { %787 = vmatmul.mubr.msk.f32.gmra.mrb[10].mxu0 %vm55_vm0, %v25_v25 }
  0x1d   :  { %811 = vmatmul.mubr.msk.f32.gmra.mrb[10].mxu1 %vm55_vm0, %v41_v26  ;;  %789 = vmatprep.mubr.msk.f32.mxu0 %vm55_vm0, %v26_v27 }
  0x1e   :  { %813 = vmatprep.mubr.msk.f32.mxu1 %vm55_vm0, %v42_v28 }
  0x20   :  { %790 = vmatmul.mubr.msk.f32.gmra.mrb[12].mxu0 %vm55_vm0, %v27_v29 }
  0x21   :  { %814 = vmatmul.mubr.msk.f32.gmra.mrb[12].mxu1 %vm55_vm0, %v43_v30  ;;  %792 = vmatprep.mubr.msk.f32.mxu0 %vm55_vm0, %v28_v31 }
  0x22   :  { %816 = vmatprep.mubr.msk.f32.mxu1 %vm55_vm0, %v44_v32 }
  0x24   :  { %793 = vmatmul.mubr.msk.f32.gmra.mrb[14].mxu0 %vm55_vm0, %v29_v33 }
  0x25   :  { %817 = vmatmul.mubr.msk.f32.gmra.mrb[14].mxu1 %vm55_vm0, %v45_v34 }
  0xdb   :  { %v773_v36 = vpop.f32.mrb[0].mxu0 }
  0xdc   :  { %v797_v37 = vpop.f32.mrb[0].mxu1  ;;  %v224_v38 = vadd.f32 %v773_v36, %v982_v35  ;;  %v218_v40 = vpop.f32.mrb[1].mxu0 }
  0xdd   :  { %v304_v39 = vadd.f32 %v797_v37, %v982_v35  ;;  %v298_v41 = vpop.f32.mrb[1].mxu1  ;;  %v219_v42 = vadd.f32 %v982_v35, %v218_v40 }
  0xde   :  { %v299_v43 = vadd.f32 %v982_v35, %v298_v41 }
  0xdf   :  { %v641_v44 = vpack.c.bf16 %v224_v38, %v219_v42  ;;  %v776_v46 = vpop.f32.mrb[2].mxu0 }
  0xe0   :  { %v681_v45 = vpack.c.bf16 %v304_v39, %v299_v43  ;;  %v800_v47 = vpop.f32.mrb[2].mxu1  ;;  %v234_v48 = vadd.f32 %v776_v46, %v982_v35  ;;  %v228_v50 = vpop.f32.mrb[3].mxu0 }
  0xe1   :  { %v314_v49 = vadd.f32 %v800_v47, %v982_v35  ;;  %v308_v51 = vpop.f32.mrb[3].mxu1  ;;  %642 = vst [vmem:[%s1067_s3] sm:$0xff] %v641_v44   ;;  %v229_v52 = vadd.f32 %v982_v35, %v228_v50 }
  0xe2   :  { %725 = vst [vmem:[%s1067_s3 + $0x40] sm:$0xff] %v681_v45   ;;  %v309_v53 = vadd.f32 %v982_v35, %v308_v51 }
  0xe3   :  { %v646_v54 = vpack.c.bf16 %v234_v48, %v229_v52  ;;  %v779_v56 = vpop.f32.mrb[4].mxu0 }
  0xe4   :  { %v686_v55 = vpack.c.bf16 %v314_v49, %v309_v53  ;;  %v803_v57 = vpop.f32.mrb[4].mxu1  ;;  %v244_v58 = vadd.f32 %v779_v56, %v982_v35  ;;  %v238_v60 = vpop.f32.mrb[5].mxu0 }
  0xe5   :  { %v324_v59 = vadd.f32 %v803_v57, %v982_v35  ;;  %v318_v61 = vpop.f32.mrb[5].mxu1  ;;  %718 = vst [vmem:[%s1067_s3 + $0x8] sm:$0xff] %v646_v54   ;;  %v239_v62 = vadd.f32 %v982_v35, %v238_v60 }
  0xe6   :  { %726 = vst [vmem:[%s1067_s3 + $0x48] sm:$0xff] %v686_v55   ;;  %v319_v63 = vadd.f32 %v982_v35, %v318_v61 }
  0xe7   :  { %v651_v0 = vpack.c.bf16 %v244_v58, %v239_v62  ;;  %v782_v2 = vpop.f32.mrb[6].mxu0 }
  0xe8   :  { %v691_v1 = vpack.c.bf16 %v324_v59, %v319_v63  ;;  %v806_v3 = vpop.f32.mrb[6].mxu1  ;;  %v254_v4 = vadd.f32 %v782_v2, %v982_v35  ;;  %v248_v6 = vpop.f32.mrb[7].mxu0 }
  0xe9   :  { %v334_v5 = vadd.f32 %v806_v3, %v982_v35  ;;  %v328_v7 = vpop.f32.mrb[7].mxu1  ;;  %719 = vst [vmem:[%s1067_s3 + $0x10] sm:$0xff] %v651_v0   ;;  %v249_v8 = vadd.f32 %v982_v35, %v248_v6 }
  0xea   :  { %727 = vst [vmem:[%s1067_s3 + $0x50] sm:$0xff] %v691_v1   ;;  %v329_v9 = vadd.f32 %v982_v35, %v328_v7 }
  0xeb   :  { %v656_v10 = vpack.c.bf16 %v254_v4, %v249_v8  ;;  %v785_v12 = vpop.f32.mrb[8].mxu0 }
  0xec   :  { %v696_v11 = vpack.c.bf16 %v334_v5, %v329_v9  ;;  %v809_v13 = vpop.f32.mrb[8].mxu1  ;;  %v264_v14 = vadd.f32 %v785_v12, %v982_v35  ;;  %v258_v16 = vpop.f32.mrb[9].mxu0 }
  0xed   :  { %v344_v15 = vadd.f32 %v809_v13, %v982_v35  ;;  %v338_v17 = vpop.f32.mrb[9].mxu1  ;;  %720 = vst [vmem:[%s1067_s3 + $0x18] sm:$0xff] %v656_v10   ;;  %v259_v18 = vadd.f32 %v982_v35, %v258_v16 }
  0xee   :  { %728 = vst [vmem:[%s1067_s3 + $0x58] sm:$0xff] %v696_v11   ;;  %v339_v19 = vadd.f32 %v982_v35, %v338_v17 }
  0xef   :  { %v661_v20 = vpack.c.bf16 %v264_v14, %v259_v18  ;;  %v788_v22 = vpop.f32.mrb[10].mxu0 }
  0xf0   :  { %v701_v21 = vpack.c.bf16 %v344_v15, %v339_v19  ;;  %v812_v23 = vpop.f32.mrb[10].mxu1  ;;  %v274_v24 = vadd.f32 %v788_v22, %v982_v35  ;;  %v268_v26 = vpop.f32.mrb[11].mxu0 }
  0xf1   :  { %v354_v25 = vadd.f32 %v812_v23, %v982_v35  ;;  %v348_v27 = vpop.f32.mrb[11].mxu1  ;;  %721 = vst [vmem:[%s1067_s3 + $0x20] sm:$0xff] %v661_v20   ;;  %v269_v28 = vadd.f32 %v982_v35, %v268_v26 }
  0xf2   :  { %729 = vst [vmem:[%s1067_s3 + $0x60] sm:$0xff] %v701_v21   ;;  %v349_v29 = vadd.f32 %v982_v35, %v348_v27 }
  0xf3   :  { %v666_v30 = vpack.c.bf16 %v274_v24, %v269_v28  ;;  %v791_v32 = vpop.f32.mrb[12].mxu0 }
  0xf4   :  { %v706_v31 = vpack.c.bf16 %v354_v25, %v349_v29  ;;  %v815_v33 = vpop.f32.mrb[12].mxu1  ;;  %v284_v34 = vadd.f32 %v791_v32, %v982_v35  ;;  %v278_v37 = vpop.f32.mrb[13].mxu0 }
  0xf5   :  { %v364_v36 = vadd.f32 %v815_v33, %v982_v35  ;;  %v358_v38 = vpop.f32.mrb[13].mxu1  ;;  %722 = vst [vmem:[%s1067_s3 + $0x28] sm:$0xff] %v666_v30   ;;  %v279_v39 = vadd.f32 %v982_v35, %v278_v37 }
  0xf6   :  { %730 = vst [vmem:[%s1067_s3 + $0x68] sm:$0xff] %v706_v31   ;;  %v359_v40 = vadd.f32 %v982_v35, %v358_v38 }
  0xf7   :  { %v671_v41 = vpack.c.bf16 %v284_v34, %v279_v39  ;;  %v794_v43 = vpop.f32.mrb[14].mxu0 }
  0xf8   :  { %v711_v42 = vpack.c.bf16 %v364_v36, %v359_v40  ;;  %v818_v44 = vpop.f32.mrb[14].mxu1  ;;  %v294_v45 = vadd.f32 %v794_v43, %v982_v35  ;;  %v288_v47 = vpop.f32.mrb[15].mxu0 }
  0xf9   :  { %v374_v46 = vadd.f32 %v818_v44, %v982_v35  ;;  %v368_v48 = vpop.f32.mrb[15].mxu1  ;;  %723 = vst [vmem:[%s1067_s3 + $0x30] sm:$0xff] %v671_v41   ;;  %v289_v49 = vadd.f32 %v982_v35, %v288_v47 }
  0xfa   :  { %731 = vst [vmem:[%s1067_s3 + $0x70] sm:$0xff] %v711_v42   ;;  %v369_v50 = vadd.f32 %v982_v35, %v368_v48 }
  0xfb   :  { %v676_v51 = vpack.c.bf16 %v294_v45, %v289_v49 }
  0xfc   :  { %v716_v52 = vpack.c.bf16 %v374_v46, %v369_v50 }
  0xfd   :  { %724 = vst [vmem:[%s1067_s3 + $0x38] sm:$0xff] %v676_v51  }
  0xfe   :  { %732 = vst [vmem:[%s1067_s3 + $0x78] sm:$0xff] %v716_v52  }

// kernel: gnn_network_forward.9
= control target key start
LH: loop header
LB: loop body
LE: loop exit
PB: predicated region body
PF: predicated region fallthrough
CT: control target
= control target key end

     0   :  { %s719_s0 = inlined_call_operand.vmem [shape: f32[256,128], index: 0, kind: input, shape index: {}]   ;;  %s720_s1 = inlined_call_operand.vmem [shape: f32[1,128], index: 1, kind: input, shape index: {}]   ;;  %s721_s2 = inlined_call_operand.vmem [shape: f32[1,128], index: 2, kind: input, shape index: {}]   ;;  %s722_s3 = inlined_call_operand.vmem [shape: bf16[256,128], index: 3, kind: output, shape index: {}]  }
   0x1   :  { %v14_v0 = vld [vmem:[%s719_s0] sm:$0xff]  ;;  %v15_v1 = vld [vmem:[%s719_s0 + $0x8] sm:$0xff]  ;;  %v16_v6 = vld [vmem:[%s719_s0 + $0x10] sm:$0xff] }
   0x2   :  { %v510_v2 = vld [vmem:[%s720_s1] ss:$0 sm:$0xff]  ;;  %v17_v7 = vld [vmem:[%s719_s0 + $0x18] sm:$0xff]  ;;  %v19_v11 = vld [vmem:[%s719_s0 + $0x28] sm:$0xff] }
   0x3   :  { %v53_v3 = vmul.f32 %v510_v2, %v14_v0  ;;  %v54_v4 = vmul.f32 %v510_v2, %v15_v1  ;;  %v517_v5 = vld [vmem:[%s721_s2] ss:$0 sm:$0xff]  ;;  %v55_v8 = vmul.f32 %v510_v2, %v16_v6  ;;  %v56_v9 = vmul.f32 %v510_v2, %v17_v7  ;;  %v20_v12 = vld [vmem:[%s719_s0 + $0x30] sm:$0xff]  ;;  %v21_v17 = vld [vmem:[%s719_s0 + $0x38] sm:$0xff] }
   0x4   :  { %v18_v10 = vld [vmem:[%s719_s0 + $0x20] sm:$0xff]  ;;  %v58_v16 = vmul.f32 %v510_v2, %v19_v11  ;;  %v59_v20 = vmul.f32 %v510_v2, %v20_v12  ;;  %v60_v21 = vmul.f32 %v510_v2, %v21_v17  ;;  %v23_v27 = vld [vmem:[%s719_s0 + $0x48] sm:$0xff]  ;;  %v24_v32 = vld [vmem:[%s719_s0 + $0x50] sm:$0xff] }
   0x5   :  { %v92_v13 = vadd.f32 %v517_v5, %v53_v3  ;;  %v93_v14 = vadd.f32 %v517_v5, %v54_v4  ;;  %v57_v15 = vmul.f32 %v510_v2, %v18_v10  ;;  %v94_v18 = vadd.f32 %v517_v5, %v55_v8  ;;  %v22_v22 = vld [vmem:[%s719_s0 + $0x40] sm:$0xff]  ;;  %v25_v33 = vld [vmem:[%s719_s0 + $0x58] sm:$0xff]  ;;  %v27_v39 = vld [vmem:[%s719_s0 + $0x68] sm:$0xff] }
   0x6   :  { %v95_v19 = vadd.f32 %v517_v5, %v56_v9  ;;  %v97_v26 = vadd.f32 %v517_v5, %v58_v16  ;;  %v98_v30 = vadd.f32 %v517_v5, %v59_v20  ;;  %v99_v31 = vadd.f32 %v517_v5, %v60_v21  ;;  %v26_v38 = vld [vmem:[%s719_s0 + $0x60] sm:$0xff]  ;;  %v28_v44 = vld [vmem:[%s719_s0 + $0x70] sm:$0xff]  ;;  %v29_v49 = vld [vmem:[%s719_s0 + $0x78] sm:$0xff] }
   0x7   :  { %v124_v23 = vmax.f32 %v92_v13, 0.0  ;;  %v125_v24 = vmax.f32 %v93_v14, 0.0  ;;  %v96_v25 = vadd.f32 %v517_v5, %v57_v15  ;;  %v126_v28 = vmax.f32 %v94_v18, 0.0  ;;  %v30_v54 = vld [vmem:[%s719_s0 + $0x80] sm:$0xff]  ;;  %v31_v63 = vld [vmem:[%s719_s0 + $0x88] sm:$0xff]  ;;  %v32_v6 = vld [vmem:[%s719_s0 + $0x90] sm:$0xff] }
   0x8   :  { %v127_v29 = vmax.f32 %v95_v19, 0.0  ;;  %v129_v36 = vmax.f32 %v97_v26, 0.0  ;;  %v61_v37 = vmul.f32 %v510_v2, %v22_v22  ;;  %v130_v41 = vmax.f32 %v98_v30, 0.0  ;;  %v33_v7 = vld [vmem:[%s719_s0 + $0x98] sm:$0xff]  ;;  %v34_v12 = vld [vmem:[%s719_s0 + $0xa0] sm:$0xff]  ;;  %v35_v13 = vld [vmem:[%s719_s0 + $0xa8] sm:$0xff] }
   0x9   :  { %v389_v34 = vpack.c.bf16 %v125_v24, %v124_v23  ;;  %v128_v35 = vmax.f32 %v96_v25, 0.0  ;;  %v131_v42 = vmax.f32 %v99_v31, 0.0  ;;  %v62_v43 = vmul.f32 %v510_v2, %v23_v27  ;;  %v36_v18 = vld [vmem:[%s719_s0 + $0xb0] sm:$0xff]  ;;  %v37_v23 = vld [vmem:[%s719_s0 + $0xb8] sm:$0xff] }
   0xa   :  { %v394_v40 = vpack.c.bf16 %v127_v29, %v126_v28  ;;  %v100_v46 = vadd.f32 %v517_v5, %v61_v37  ;;  %v63_v47 = vmul.f32 %v510_v2, %v24_v32  ;;  %v64_v48 = vmul.f32 %v510_v2, %v25_v33  ;;  %v38_v28 = vld [vmem:[%s719_s0 + $0xc0] sm:$0xff]  ;;  %v39_v37 = vld [vmem:[%s719_s0 + $0xc8] sm:$0xff] }
   0xb   :  { %390 = vst [vmem:[%s722_s3] sm:$0xff] %v389_v34   ;;  %v399_v45 = vpack.c.bf16 %v129_v36, %v128_v35  ;;  %v404_v50 = vpack.c.bf16 %v131_v42, %v130_v41  ;;  %v101_v51 = vadd.f32 %v517_v5, %v62_v43  ;;  %v65_v52 = vmul.f32 %v510_v2, %v26_v38  ;;  %v40_v42 = vld [vmem:[%s719_s0 + $0xd0] sm:$0xff]  ;;  %v41_v43 = vld [vmem:[%s719_s0 + $0xd8] sm:$0xff] }
   0xc   :  { %466 = vst [vmem:[%s722_s3 + $0x8] sm:$0xff] %v394_v40   ;;  %v66_v53 = vmul.f32 %v510_v2, %v27_v39  ;;  %v132_v55 = vmax.f32 %v100_v46, 0.0  ;;  %v102_v56 = vadd.f32 %v517_v5, %v63_v47  ;;  %v103_v57 = vadd.f32 %v517_v5, %v64_v48  ;;  %v42_v48 = vld [vmem:[%s719_s0 + $0xe0] sm:$0xff] }
   0xd   :  { %467 = vst [vmem:[%s722_s3 + $0x10] sm:$0xff] %v399_v45   ;;  %v67_v58 = vmul.f32 %v510_v2, %v28_v44  ;;  %468 = vst [vmem:[%s722_s3 + $0x18] sm:$0xff] %v404_v50   ;;  %v133_v59 = vmax.f32 %v101_v51, 0.0  ;;  %v104_v60 = vadd.f32 %v517_v5, %v65_v52  ;;  %v68_v62 = vmul.f32 %v510_v2, %v29_v49  ;;  %v43_v49 = vld [vmem:[%s719_s0 + $0xe8] sm:$0xff] }
   0xe   :  { %v105_v61 = vadd.f32 %v517_v5, %v66_v53  ;;  %v134_v0 = vmax.f32 %v102_v56, 0.0  ;;  %v135_v1 = vmax.f32 %v103_v57, 0.0  ;;  %v69_v4 = vmul.f32 %v510_v2, %v30_v54  ;;  %v44_v54 = vld [vmem:[%s719_s0 + $0xf0] sm:$0xff] }
   0xf   :  { %v106_v3 = vadd.f32 %v517_v5, %v67_v58  ;;  %v409_v8 = vpack.c.bf16 %v133_v59, %v132_v55  ;;  %v136_v9 = vmax.f32 %v104_v60, 0.0  ;;  %v107_v11 = vadd.f32 %v517_v5, %v68_v62  ;;  %v45_v59 = vld [vmem:[%s719_s0 + $0xf8] sm:$0xff] }
  0x10   :  { %v137_v10 = vmax.f32 %v105_v61, 0.0  ;;  %v414_v14 = vpack.c.bf16 %v135_v1, %v134_v0  ;;  %v70_v16 = vmul.f32 %v510_v2, %v31_v63  ;;  %v108_v17 = vadd.f32 %v517_v5, %v69_v4 }
  0x11   :  { %v138_v15 = vmax.f32 %v106_v3, 0.0  ;;  %469 = vst [vmem:[%s722_s3 + $0x20] sm:$0xff] %v409_v8   ;;  %v139_v20 = vmax.f32 %v107_v11, 0.0  ;;  %v71_v21 = vmul.f32 %v510_v2, %v32_v6  ;;  %v72_v22 = vmul.f32 %v510_v2, %v33_v7 }
  0x12   :  { %v419_v19 = vpack.c.bf16 %v137_v10, %v136_v9  ;;  %470 = vst [vmem:[%s722_s3 + $0x28] sm:$0xff] %v414_v14   ;;  %v109_v24 = vadd.f32 %v517_v5, %v70_v16  ;;  %v140_v25 = vmax.f32 %v108_v17, 0.0  ;;  %v73_v26 = vmul.f32 %v510_v2, %v34_v12 }
  0x13   :  { %v74_v27 = vmul.f32 %v510_v2, %v35_v13  ;;  %v424_v29 = vpack.c.bf16 %v139_v20, %v138_v15  ;;  %v110_v30 = vadd.f32 %v517_v5, %v71_v21  ;;  %v111_v31 = vadd.f32 %v517_v5, %v72_v22 }
  0x14   :  { %471 = vst [vmem:[%s722_s3 + $0x30] sm:$0xff] %v419_v19   ;;  %v75_v32 = vmul.f32 %v510_v2, %v36_v18  ;;  %v141_v33 = vmax.f32 %v109_v24, 0.0  ;;  %v112_v34 = vadd.f32 %v517_v5, %v73_v26  ;;  %v76_v36 = vmul.f32 %v510_v2, %v37_v23 }
  0x15   :  { %v113_v35 = vadd.f32 %v517_v5, %v74_v27  ;;  %472 = vst [vmem:[%s722_s3 + $0x38] sm:$0xff] %v424_v29   ;;  %v142_v38 = vmax.f32 %v110_v30, 0.0  ;;  %v143_v39 = vmax.f32 %v111_v31, 0.0  ;;  %v77_v41 = vmul.f32 %v510_v2, %v38_v28 }
  0x16   :  { %v114_v40 = vadd.f32 %v517_v5, %v75_v32  ;;  %v429_v44 = vpack.c.bf16 %v141_v33, %v140_v25  ;;  %v144_v45 = vmax.f32 %v112_v34, 0.0  ;;  %v115_v47 = vadd.f32 %v517_v5, %v76_v36 }
  0x17   :  { %v145_v46 = vmax.f32 %v113_v35, 0.0  ;;  %v434_v50 = vpack.c.bf16 %v143_v39, %v142_v38  ;;  %v78_v52 = vmul.f32 %v510_v2, %v39_v37  ;;  %v116_v53 = vadd.f32 %v517_v5, %v77_v41 }
  0x18   :  { %v146_v51 = vmax.f32 %v114_v40, 0.0  ;;  %473 = vst [vmem:[%s722_s3 + $0x40] sm:$0xff] %v429_v44   ;;  %v147_v56 = vmax.f32 %v115_v47, 0.0  ;;  %v79_v57 = vmul.f32 %v510_v2, %v40_v42  ;;  %v80_v58 = vmul.f32 %v510_v2, %v41_v43 }
  0x19   :  { %v439_v55 = vpack.c.bf16 %v145_v46, %v144_v45  ;;  %474 = vst [vmem:[%s722_s3 + $0x48] sm:$0xff] %v434_v50   ;;  %v117_v60 = vadd.f32 %v517_v5, %v78_v52  ;;  %v148_v61 = vmax.f32 %v116_v53, 0.0  ;;  %v81_v62 = vmul.f32 %v510_v2, %v42_v48 }
  0x1a   :  { %v82_v63 = vmul.f32 %v510_v2, %v43_v49  ;;  %v444_v0 = vpack.c.bf16 %v147_v56, %v146_v51  ;;  %v118_v1 = vadd.f32 %v517_v5, %v79_v57  ;;  %v119_v3 = vadd.f32 %v517_v5, %v80_v58 }
  0x1b   :  { %475 = vst [vmem:[%s722_s3 + $0x50] sm:$0xff] %v439_v55   ;;  %v83_v4 = vmul.f32 %v510_v2, %v44_v54  ;;  %v149_v6 = vmax.f32 %v117_v60, 0.0  ;;  %v120_v7 = vadd.f32 %v517_v5, %v81_v62  ;;  %v84_v9 = vmul.f32 %v510_v2, %v45_v59 }
  0x1c   :  { %v121_v8 = vadd.f32 %v517_v5, %v82_v63  ;;  %476 = vst [vmem:[%s722_s3 + $0x58] sm:$0xff] %v444_v0   ;;  %v150_v10 = vmax.f32 %v118_v1, 0.0  ;;  %v151_v11 = vmax.f32 %v119_v3, 0.0 }
  0x1d   :  { %v122_v12 = vadd.f32 %v517_v5, %v83_v4  ;;  %v449_v13 = vpack.c.bf16 %v149_v6, %v148_v61  ;;  %v152_v14 = vmax.f32 %v120_v7, 0.0  ;;  %v123_v16 = vadd.f32 %v517_v5, %v84_v9 }
  0x1e   :  { %v153_v15 = vmax.f32 %v121_v8, 0.0  ;;  %v454_v17 = vpack.c.bf16 %v151_v11, %v150_v10 }
  0x1f   :  { %v154_v18 = vmax.f32 %v122_v12, 0.0  ;;  %477 = vst [vmem:[%s722_s3 + $0x60] sm:$0xff] %v449_v13   ;;  %v155_v19 = vmax.f32 %v123_v16, 0.0 }
  0x20   :  { %v459_v2 = vpack.c.bf16 %v153_v15, %v152_v14  ;;  %478 = vst [vmem:[%s722_s3 + $0x68] sm:$0xff] %v454_v17  }
  0x21   :  { %v464_v20 = vpack.c.bf16 %v155_v19, %v154_v18 }
  0x22   :  { %479 = vst [vmem:[%s722_s3 + $0x70] sm:$0xff] %v459_v2  }
  0x23   :  { %480 = vst [vmem:[%s722_s3 + $0x78] sm:$0xff] %v464_v20  }

// kernel: gnn_network_forward.13
= control target key start
LH: loop header
LB: loop body
LE: loop exit
PB: predicated region body
PF: predicated region fallthrough
CT: control target
= control target key end

     0   :  { %s439_s0 = inlined_call_operand.vmem [shape: f32[256,128], index: 0, kind: input, shape index: {}]   ;;  %s440_s1 = inlined_call_operand.vmem [shape: f32[1,128], index: 1, kind: input, shape index: {}]   ;;  %s441_s2 = inlined_call_operand.vmem [shape: f32[1,128], index: 2, kind: input, shape index: {}]   ;;  %s442_s3 = inlined_call_operand.hbm [shape: f32[256,128], index: 3, kind: output, shape index: {}]  }
   0x1   :  { %v15_v0 = vld [vmem:[%s439_s0] sm:$0xff]  ;;  %v16_v4 = vld [vmem:[%s439_s0 + $0x8] sm:$0xff]  ;;  %v17_v5 = vld [vmem:[%s439_s0 + $0x10] sm:$0xff] }
   0x2   :  { %v263_v1 = vld [vmem:[%s440_s1] ss:$0 sm:$0xff]  ;;  %v18_v6 = vld [vmem:[%s439_s0 + $0x18] sm:$0xff]  ;;  %v20_v11 = vld [vmem:[%s439_s0 + $0x28] sm:$0xff] }
   0x3   :  { %v268_v2 = vld [vmem:[%s441_s2] ss:$0 sm:$0xff]  ;;  %v54_v3 = vmul.f32 %v263_v1, %v15_v0  ;;  %v55_v7 = vmul.f32 %v263_v1, %v16_v4  ;;  %v56_v8 = vmul.f32 %v263_v1, %v17_v5  ;;  %v57_v9 = vmul.f32 %v263_v1, %v18_v6  ;;  %v21_v12 = vld [vmem:[%s439_s0 + $0x30] sm:$0xff]  ;;  %v22_v17 = vld [vmem:[%s439_s0 + $0x38] sm:$0xff] }
   0x4   :  { %v19_v10 = vld [vmem:[%s439_s0 + $0x20] sm:$0xff]  ;;  %v59_v15 = vmul.f32 %v263_v1, %v20_v11  ;;  %v60_v16 = vmul.f32 %v263_v1, %v21_v12  ;;  %v61_v21 = vmul.f32 %v263_v1, %v22_v17  ;;  %v24_v27 = vld [vmem:[%s439_s0 + $0x48] sm:$0xff]  ;;  %v25_v28 = vld [vmem:[%s439_s0 + $0x50] sm:$0xff] }
   0x5   :  { %v93_v13 = vadd.f32 %v268_v2, %v54_v3  ;;  %v58_v14 = vmul.f32 %v263_v1, %v19_v10  ;;  %v94_v18 = vadd.f32 %v268_v2, %v55_v7  ;;  %v95_v19 = vadd.f32 %v268_v2, %v56_v8  ;;  %v23_v22 = vld [vmem:[%s439_s0 + $0x40] sm:$0xff]  ;;  %v26_v29 = vld [vmem:[%s439_s0 + $0x58] sm:$0xff]  ;;  %v28_v35 = vld [vmem:[%s439_s0 + $0x68] sm:$0xff] }
   0x6   :  { %v96_v20 = vadd.f32 %v268_v2, %v57_v9  ;;  %v98_v25 = vadd.f32 %v268_v2, %v59_v15  ;;  %v99_v26 = vadd.f32 %v268_v2, %v60_v16  ;;  %v100_v33 = vadd.f32 %v268_v2, %v61_v21  ;;  %v27_v34 = vld [vmem:[%s439_s0 + $0x60] sm:$0xff]  ;;  %v29_v36 = vld [vmem:[%s439_s0 + $0x70] sm:$0xff]  ;;  %v30_v41 = vld [vmem:[%s439_s0 + $0x78] sm:$0xff] }
   0x7   :  { %v125_v23 = vmax.f32 %v93_v13, 0.0  ;;  %v97_v24 = vadd.f32 %v268_v2, %v58_v14  ;;  %v126_v30 = vmax.f32 %v94_v18, 0.0  ;;  %v127_v31 = vmax.f32 %v95_v19, 0.0  ;;  %v31_v54 = vld [vmem:[%s439_s0 + $0x80] sm:$0xff]  ;;  %v32_v55 = vld [vmem:[%s439_s0 + $0x88] sm:$0xff]  ;;  %v33_v60 = vld [vmem:[%s439_s0 + $0x90] sm:$0xff] }
   0x8   :  { %v128_v32 = vmax.f32 %v96_v20, 0.0  ;;  %v130_v38 = vmax.f32 %v98_v25, 0.0  ;;  %v131_v39 = vmax.f32 %v99_v26, 0.0  ;;  %v62_v40 = vmul.f32 %v263_v1, %v23_v22  ;;  %v34_v61 = vld [vmem:[%s439_s0 + $0x98] sm:$0xff] }
   0x9   :  { %157 = vst [vmem:[#allocation2] sm:$0xff] %v125_v23  ;;  %v129_v37 = vmax.f32 %v97_v24, 0.0  ;;  %158 = vst [vmem:[#allocation2 + $0x8] sm:$0xff] %v126_v30  ;;  %v132_v42 = vmax.f32 %v100_v33, 0.0  ;;  %v63_v43 = vmul.f32 %v263_v1, %v24_v27  ;;  %v64_v44 = vmul.f32 %v263_v1, %v25_v28 }
   0xa   :  { %159 = vst [vmem:[#allocation2 + $0x10] sm:$0xff] %v127_v31  ;;  %160 = vst [vmem:[#allocation2 + $0x18] sm:$0xff] %v128_v32  ;;  %v65_v45 = vmul.f32 %v263_v1, %v26_v29  ;;  %v101_v46 = vadd.f32 %v268_v2, %v62_v40  ;;  %v66_v47 = vmul.f32 %v263_v1, %v27_v34 }
   0xb   :  { %161 = vst [vmem:[#allocation2 + $0x20] sm:$0xff] %v129_v37  ;;  %162 = vst [vmem:[#allocation2 + $0x28] sm:$0xff] %v130_v38  ;;  %v67_v48 = vmul.f32 %v263_v1, %v28_v35  ;;  %v68_v49 = vmul.f32 %v263_v1, %v29_v36  ;;  %v102_v50 = vadd.f32 %v268_v2, %v63_v43 }
   0xc   :  { %163 = vst [vmem:[#allocation2 + $0x30] sm:$0xff] %v131_v39  ;;  %164 = vst [vmem:[#allocation2 + $0x38] sm:$0xff] %v132_v42  ;;  %v103_v51 = vadd.f32 %v268_v2, %v64_v44  ;;  %v104_v52 = vadd.f32 %v268_v2, %v65_v45  ;;  %v69_v53 = vmul.f32 %v263_v1, %v30_v41  ;;  %v133_v56 = vmax.f32 %v101_v46, 0.0 }
   0xd   :  { %v105_v57 = vadd.f32 %v268_v2, %v66_v47  ;;  %v106_v58 = vadd.f32 %v268_v2, %v67_v48  ;;  %v107_v59 = vadd.f32 %v268_v2, %v68_v49 }
   0xe   :  { %8 = vsyncpa [#allocation3], 0  ;;  %v134_v62 = vmax.f32 %v102_v50, 0.0  ;;  %v135_v63 = vmax.f32 %v103_v51, 0.0  ;;  %v136_v0 = vmax.f32 %v104_v52, 0.0  ;;  %v108_v3 = vadd.f32 %v268_v2, %v69_v53  ;;  %v35_v4 = vld [vmem:[%s439_s0 + $0xa0] sm:$0xff] }
   0xf   :  { %v36_v5 = vld [vmem:[%s439_s0 + $0xa8] sm:$0xff]  ;;  %v37_v6 = vld [vmem:[%s439_s0 + $0xb0] sm:$0xff]  ;;  %165 = vst [vmem:[#allocation2 + $0x40] sm:$0xff] %v133_v56  ;;  %v137_v7 = vmax.f32 %v105_v57, 0.0  ;;  %v138_v8 = vmax.f32 %v106_v58, 0.0  ;;  %v139_v9 = vmax.f32 %v107_v59, 0.0  ;;  %v70_v10 = vmul.f32 %v263_v1, %v31_v54 }
  0x10   :  { %v38_v11 = vld [vmem:[%s439_s0 + $0xb8] sm:$0xff]  ;;  %166 = vst [vmem:[#allocation2 + $0x48] sm:$0xff] %v134_v62  ;;  %167 = vst [vmem:[#allocation2 + $0x50] sm:$0xff] %v135_v63  ;;  %v140_v12 = vmax.f32 %v108_v3, 0.0  ;;  %v71_v13 = vmul.f32 %v263_v1, %v32_v55  ;;  %v72_v14 = vmul.f32 %v263_v1, %v33_v60  ;;  %v73_v15 = vmul.f32 %v263_v1, %v34_v61  ;;  %v39_v24 = vld [vmem:[%s439_s0 + $0xc0] sm:$0xff] }
  0x11   :  { %168 = vst [vmem:[#allocation2 + $0x58] sm:$0xff] %v136_v0  ;;  %169 = vst [vmem:[#allocation2 + $0x60] sm:$0xff] %v137_v7  ;;  %v109_v16 = vadd.f32 %v268_v2, %v70_v10  ;;  %v74_v17 = vmul.f32 %v263_v1, %v35_v4  ;;  %v75_v18 = vmul.f32 %v263_v1, %v36_v5  ;;  %v40_v29 = vld [vmem:[%s439_s0 + $0xc8] sm:$0xff]  ;;  %v41_v30 = vld [vmem:[%s439_s0 + $0xd0] sm:$0xff] }
  0x12   :  { %170 = vst [vmem:[#allocation2 + $0x68] sm:$0xff] %v138_v8  ;;  %171 = vst [vmem:[#allocation2 + $0x70] sm:$0xff] %v139_v9  ;;  %v76_v19 = vmul.f32 %v263_v1, %v37_v6  ;;  %v110_v20 = vadd.f32 %v268_v2, %v71_v13  ;;  %v111_v21 = vadd.f32 %v268_v2, %v72_v14  ;;  %v42_v31 = vld [vmem:[%s439_s0 + $0xd8] sm:$0xff]  ;;  %v43_v36 = vld [vmem:[%s439_s0 + $0xe0] sm:$0xff] }
  0x13   :  { %172 = vst [vmem:[#allocation2 + $0x78] sm:$0xff] %v140_v12  ;;  %v112_v22 = vadd.f32 %v268_v2, %v73_v15  ;;  %v77_v23 = vmul.f32 %v263_v1, %v38_v11  ;;  %v141_v25 = vmax.f32 %v109_v16, 0.0  ;;  %v113_v26 = vadd.f32 %v268_v2, %v74_v17  ;;  %v44_v37 = vld [vmem:[%s439_s0 + $0xe8] sm:$0xff]  ;;  %v45_v38 = vld [vmem:[%s439_s0 + $0xf0] sm:$0xff]  ;;  %v46_v43 = vld [vmem:[%s439_s0 + $0xf8] sm:$0xff]  ;;  %s234_s0 = smov [#allocation2]  }
  0x14   :  { %v114_v27 = vadd.f32 %v268_v2, %v75_v18  ;;  %v115_v28 = vadd.f32 %v268_v2, %v76_v19  ;;  %v142_v32 = vmax.f32 %v110_v20, 0.0  ;;  %v143_v33 = vmax.f32 %v111_v21, 0.0  ;;  %s194_s22 = sshll.u32 %s234_s0, 4  ;;  %s195_s22 = int_to_ptr.vmem [resolvable:$true] %s194_s22 }
  0x15   :  { %v144_v34 = vmax.f32 %v112_v22, 0.0  ;;  %v116_v35 = vadd.f32 %v268_v2, %v77_v23  ;;  %173 = vst [vmem:[#allocation2 + $0x80] sm:$0xff] %v141_v25  ;;  %v145_v39 = vmax.f32 %v113_v26, 0.0  ;;  %v78_v42 = vmul.f32 %v263_v1, %v39_v24  ;;  %s210_s23 = scalar_lea.vmem %s195_s22, 4096  ;;  %p215_p1 = scmp.lt.s32.totalorder %s195_s22, %s195_s22 }
  0x16   :  { %v146_v40 = vmax.f32 %v114_v27, 0.0  ;;  %v147_v41 = vmax.f32 %v115_v28, 0.0  ;;  %174 = vst [vmem:[#allocation2 + $0x88] sm:$0xff] %v142_v32  ;;  %175 = vst [vmem:[#allocation2 + $0x90] sm:$0xff] %v143_v33  ;;  %v79_v45 = vmul.f32 %v263_v1, %v40_v29  ;;  %v80_v46 = vmul.f32 %v263_v1, %v41_v30  ;;  %p211_p0 = scmp.ne.s32.totalorder %s195_s22, %s210_s23  ;;  %p216_p2 = scmp.lt.s32.totalorder %s210_s23, %s210_s23 }
  0x17   :  { %176 = vst [vmem:[#allocation2 + $0x98] sm:$0xff] %v144_v34  ;;  %v148_v44 = vmax.f32 %v116_v35, 0.0  ;;  %v81_v47 = vmul.f32 %v263_v1, %v42_v31  ;;  %177 = vst [vmem:[#allocation2 + $0xa0] sm:$0xff] %v145_v39  ;;  %v117_v48 = vadd.f32 %v268_v2, %v78_v42  ;;  %v82_v49 = vmul.f32 %v263_v1, %v43_v36 }
  0x18   :  { %178 = vst [vmem:[#allocation2 + $0xa8] sm:$0xff] %v146_v40  ;;  %179 = vst [vmem:[#allocation2 + $0xb0] sm:$0xff] %v147_v41  ;;  %v83_v50 = vmul.f32 %v263_v1, %v44_v37  ;;  %v84_v51 = vmul.f32 %v263_v1, %v45_v38  ;;  %v118_v52 = vadd.f32 %v268_v2, %v79_v45  ;;  %p217_p3 = por %p216_p2, %p215_p1 }
  0x19   :  { %180 = vst [vmem:[#allocation2 + $0xb8] sm:$0xff] %v148_v44  ;;  %v119_v53 = vadd.f32 %v268_v2, %v80_v46  ;;  %v120_v54 = vadd.f32 %v268_v2, %v81_v47  ;;  %v85_v55 = vmul.f32 %v263_v1, %v46_v43  ;;  %v149_v56 = vmax.f32 %v117_v48, 0.0 }
  0x1a   :  { %v121_v57 = vadd.f32 %v268_v2, %v82_v49  ;;  %v122_v58 = vadd.f32 %v268_v2, %v83_v50  ;;  %v123_v59 = vadd.f32 %v268_v2, %v84_v51  ;;  %v150_v60 = vmax.f32 %v118_v52, 0.0  ;;  %p218_p4 = pnand %p217_p3, %p211_p0 }
  0x1b   :  { %v151_v61 = vmax.f32 %v119_v53, 0.0  ;;  %v152_v62 = vmax.f32 %v120_v54, 0.0  ;;  %v124_v63 = vadd.f32 %v268_v2, %v85_v55  ;;  %181 = vst [vmem:[#allocation2 + $0xc0] sm:$0xff] %v149_v56 }
  0x1c   :  { %v153_v0 = vmax.f32 %v121_v57, 0.0  ;;  %v154_v3 = vmax.f32 %v122_v58, 0.0  ;;  %v155_v4 = vmax.f32 %v123_v59, 0.0  ;;  %182 = vst [vmem:[#allocation2 + $0xc8] sm:$0xff] %v150_v60 }
  0x1d   :  { %183 = vst [vmem:[#allocation2 + $0xd0] sm:$0xff] %v151_v61  ;;  %184 = vst [vmem:[#allocation2 + $0xd8] sm:$0xff] %v152_v62  ;;  %v156_v1 = vmax.f32 %v124_v63, 0.0 }
  0x1e   :  { %185 = vst [vmem:[#allocation2 + $0xe0] sm:$0xff] %v153_v0  ;;  %186 = vst [vmem:[#allocation2 + $0xe8] sm:$0xff] %v154_v3 }
  0x1f   :  { %187 = vst [vmem:[#allocation2 + $0xf0] sm:$0xff] %v155_v4  ;;  %188 = vst [vmem:[#allocation2 + $0xf8] sm:$0xff] %v156_v1 }
  0x20   :  { %221 = shalt.err (!%p218_p4)
}
  0x21   :  { %s222_s24 = scalar_lea.hbm %s442_s3, 4096 }
  0x22   :  { %p223_p5 = scmp.ne.s32.totalorder %s442_s3, %s222_s24  ;;  %p226_p6 = scmp.lt.u32.totalorder %s222_s24, %s442_s3 }
  0x24   :  { %p228_p7 = pnand %p226_p6, %p223_p5 }
  0x26   :  { %231 = shalt.err (!%p228_p7)
}
  0x27   :  { %s235_s29 = smov 128   ;;  %s236_s30 = smov 8  }
  0x28   :  { %200 = dma.vmem_to_hbm [thread:$0]  %s195_s22, 4096, %s442_s3, [#allocation3], %s235_s29, %s235_s29, %s236_s30  }
  0x29   :  { %232 = dma.done.wait [#allocation3], 4096  }
  0x2a   :  { %233 = vsyncadd [#allocation3], 4294963200 }
  0x2b   :  { %204 = vsyncpa [#allocation3], 1 }

// kernel: gnn_network_forward.8
= control target key start
LH: loop header
LB: loop body
LE: loop exit
PB: predicated region body
PF: predicated region fallthrough
CT: control target
= control target key end

     0   :  { %vm556_vm0 = vcmask 64512   ;;  %s2519_s1 = inlined_call_operand.vmem [shape: bf16[256,128], index: 1, kind: input, shape index: {}]   ;;  %s2520_s0 = inlined_call_operand.vmem [shape: bf16[256,256], index: 0, kind: input, shape index: {}]   ;;  %s2521_s4 = inlined_call_operand.vmem [shape: f32[8,128], index: 4, kind: input, shape index: {}]   ;;  %s2522_s2 = inlined_call_operand.vmem [shape: f32[256,8], index: 2, kind: input, shape index: {}]   ;;  %s2523_s3 = inlined_call_operand.vmem [shape: f32[128,128], index: 3, kind: input, shape index: {}]   ;;  %s2524_s5 = inlined_call_operand.vmem [shape: f32[1,128], index: 5, kind: input, shape index: {}]   ;;  %s2525_s6 = inlined_call_operand.vmem [shape: f32[256,128], index: 6, kind: output, shape index: {0}]   ;;  %s2526_s7 = inlined_call_operand.vmem [shape: f32[8,128], index: 7, kind: output, shape index: {1}]  }
   0x1   :  { %v1956_v0 = vld [vmem:[%s2519_s1 + $0x40] sm:$0xff]   ;;  %v1958_v2 = vld [vmem:[%s2519_s1 + $0x48] sm:$0xff]   ;;  %v1960_v4 = vld [vmem:[%s2519_s1 + $0x50] sm:$0xff]  }
   0x2   :  { %v1957_v1 = vld [vmem:[%s2519_s1] sm:$0xff]   ;;  %1569 = vmatprep.subr.bf16.mxu0 %v1956_v0  ;;  %v1959_v3 = vld [vmem:[%s2519_s1 + $0x8] sm:$0xff]   ;;  %v1961_v5 = vld [vmem:[%s2519_s1 + $0x10] sm:$0xff]  }
   0x3   :  { %1570 = vmatpush3.bf16.msra.mxu0 %v1957_v1  ;;  %v1962_v6 = vld [vmem:[%s2519_s1 + $0x58] sm:$0xff]   ;;  %v1964_v8 = vld [vmem:[%s2519_s1 + $0x60] sm:$0xff]   ;;  %v1966_v10 = vld [vmem:[%s2519_s1 + $0x68] sm:$0xff]  }
   0x4   :  { %1571 = vmatprep.subr.bf16.mxu0 %v1958_v2  ;;  %v1963_v7 = vld [vmem:[%s2519_s1 + $0x18] sm:$0xff]   ;;  %v1965_v9 = vld [vmem:[%s2519_s1 + $0x20] sm:$0xff]   ;;  %v1967_v12 = vld [vmem:[%s2519_s1 + $0x28] sm:$0xff]  }
   0x5   :  { %v1974_v11 = vld [vmem:[%s2520_s0 + $0x4] ss:$8 sps:$4 sm:$0xff]   ;;  %v1968_v13 = vld [vmem:[%s2519_s1 + $0x70] sm:$0xff]   ;;  %v1970_v15 = vld [vmem:[%s2519_s1 + $0x78] sm:$0xff]  }
   0x6   :  { %378 = vmatprep.mubr.bf16.mxu0 %v1974_v11  ;;  %v1969_v14 = vld [vmem:[%s2519_s1 + $0x30] sm:$0xff]   ;;  %v1971_v16 = vld [vmem:[%s2519_s1 + $0x38] sm:$0xff]   ;;  %v1972_v17 = vld [vmem:[%s2520_s0] ss:$8 sps:$4 sm:$0xff]  }
   0x7   :  { %1572 = vmatpush3.bf16.msra.mxu0 %v1959_v3  ;;  %v1975_v18 = vld [vmem:[%s2520_s0 + $0x14] ss:$8 sps:$4 sm:$0xff]   ;;  %v555_v19 = vld [vmem:[%s2521_s4] sm:$0xff]  ;;  %v1977_v21 = vld [vmem:[%s2520_s0 + $0x10] ss:$8 sps:$4 sm:$0xff]  }
   0x8   :  { %1573 = vmatprep.subr.bf16.mxu0 %v1960_v4  ;;  %v523_v20 = vld [vmem:[%s2522_s2] sm:$0xff]  ;;  %1762 = vmatprep.subr.mxu1 %v555_v19  ;;  %v524_v22 = vld [vmem:[%s2522_s2 + $0x8] sm:$0xff]  ;;  %v525_v23 = vld [vmem:[%s2522_s2 + $0x10] sm:$0xff] }
   0x9   :  { %1764 = vmatprep.mubr.msk.f32.mxu1 %vm556_vm0, %v523_v20  ;;  %v1978_v24 = vld [vmem:[%s2520_s0 + $0x24] ss:$8 sps:$4 sm:$0xff]   ;;  %1763 = vmatpush3.msra.mxu1 %v555_v19  ;;  %v526_v25 = vld [vmem:[%s2522_s2 + $0x18] sm:$0xff]  ;;  %v509_v31 = vld [vmem:[%s2523_s3 + $0x10] sm:$0xff] }
   0xa   :  { %1765 = vmatmul.mubr.msk.f32.vlgmr.msra.gmra.mrb[0].mxu1 %vm556_vm0, %v524_v22  ;;  %v527_v26 = vld [vmem:[%s2522_s2 + $0x20] sm:$0xff]  ;;  %v508_v28 = vld [vmem:[%s2523_s3 + $0x8] sm:$0xff]  ;;  %v510_v32 = vld [vmem:[%s2523_s3 + $0x18] sm:$0xff] }
   0xb   :  { %1574 = vmatpush3.bf16.msra.mxu0 %v1961_v5  ;;  %1767 = vmatprep.mubr.msk.f32.mxu1 %vm556_vm0, %v525_v23  ;;  %v507_v27 = vld [vmem:[%s2523_s3] sm:$0xff]  ;;  %v528_v29 = vld [vmem:[%s2522_s2 + $0x28] sm:$0xff]  ;;  %v529_v34 = vld [vmem:[%s2522_s2 + $0x30] sm:$0xff]  ;;  %v1896_v35 = vpack.c.bf16 %v510_v32, %v509_v31 }
   0xc   :  { %1575 = vmatprep.subr.bf16.mxu0 %v1962_v6  ;;  %v1892_v30 = vpack.c.bf16 %v508_v28, %v507_v27  ;;  %v1980_v33 = vld [vmem:[%s2520_s0 + $0x20] ss:$8 sps:$4 sm:$0xff]   ;;  %v1981_v36 = vld [vmem:[%s2520_s0 + $0x34] ss:$8 sps:$4 sm:$0xff]   ;;  %v1983_v45 = vld [vmem:[%s2520_s0 + $0x30] ss:$8 sps:$4 sm:$0xff]  }
   0xd   :  { %v511_v37 = vld [vmem:[%s2523_s3 + $0x20] sm:$0xff]  ;;  %v512_v38 = vld [vmem:[%s2523_s3 + $0x28] sm:$0xff]  ;;  %v530_v39 = vld [vmem:[%s2522_s2 + $0x38] sm:$0xff] }
   0xe   :  { %1768 = vmatmul.mubr.msk.f32.gmra.mrb[2].mxu1 %vm556_vm0, %v526_v25  ;;  %1893 = vmatprep.subr.bf16.mxu1 %v1892_v30  ;;  %v531_v40 = vld [vmem:[%s2522_s2 + $0x40] sm:$0xff]  ;;  %v1900_v41 = vpack.c.bf16 %v512_v38, %v511_v37  ;;  %v513_v42 = vld [vmem:[%s2523_s3 + $0x30] sm:$0xff]  ;;  %v514_v43 = vld [vmem:[%s2523_s3 + $0x38] sm:$0xff] }
   0xf   :  { %1576 = vmatpush3.bf16.msra.mxu0 %v1963_v7  ;;  %1770 = vmatprep.mubr.msk.f32.mxu1 %vm556_vm0, %v527_v26  ;;  %v532_v44 = vld [vmem:[%s2522_s2 + $0x48] sm:$0xff]  ;;  %v533_v46 = vld [vmem:[%s2522_s2 + $0x50] sm:$0xff]  ;;  %v1904_v47 = vpack.c.bf16 %v514_v43, %v513_v42  ;;  %v515_v49 = vld [vmem:[%s2523_s3 + $0x40] sm:$0xff] }
  0x10   :  { %1577 = vmatprep.subr.bf16.mxu0 %v1964_v8  ;;  %1895 = vmatpush3.bf16.msra.mxu1 %v1892_v30  ;;  %v1984_v48 = vld [vmem:[%s2520_s0 + $0x44] ss:$8 sps:$4 sm:$0xff]   ;;  %v534_v51 = vld [vmem:[%s2522_s2 + $0x58] sm:$0xff]  ;;  %v517_v54 = vld [vmem:[%s2523_s3 + $0x50] sm:$0xff] }
  0x11   :  { %1897 = vmatprep.subr.bf16.mxu1 %v1896_v35  ;;  %v516_v50 = vld [vmem:[%s2523_s3 + $0x48] sm:$0xff]  ;;  %v535_v52 = vld [vmem:[%s2522_s2 + $0x60] sm:$0xff]  ;;  %v518_v55 = vld [vmem:[%s2523_s3 + $0x58] sm:$0xff] }
  0x12   :  { %1771 = vmatmul.mubr.msk.f32.gmra.mrb[4].mxu1 %vm556_vm0, %v528_v29  ;;  %v1908_v53 = vpack.c.bf16 %v516_v50, %v515_v49  ;;  %v536_v56 = vld [vmem:[%s2522_s2 + $0x68] sm:$0xff]  ;;  %v537_v58 = vld [vmem:[%s2522_s2 + $0x70] sm:$0xff]  ;;  %v1912_v59 = vpack.c.bf16 %v518_v55, %v517_v54  ;;  %v519_v61 = vld [vmem:[%s2523_s3 + $0x60] sm:$0xff] }
  0x13   :  { %1578 = vmatpush3.bf16.msra.mxu0 %v1965_v9  ;;  %1773 = vmatprep.mubr.msk.f32.mxu1 %vm556_vm0, %v529_v34  ;;  %v1986_v57 = vld [vmem:[%s2520_s0 + $0x40] ss:$8 sps:$4 sm:$0xff]   ;;  %v1987_v60 = vld [vmem:[%s2520_s0 + $0x54] ss:$8 sps:$4 sm:$0xff]   ;;  %v1989_v3 = vld [vmem:[%s2520_s0 + $0x50] ss:$8 sps:$4 sm:$0xff]  }
  0x14   :  { %1579 = vmatprep.subr.bf16.mxu0 %v1966_v10  ;;  %1899 = vmatpush3.bf16.msra.mxu1 %v1896_v35  ;;  %v520_v62 = vld [vmem:[%s2523_s3 + $0x68] sm:$0xff]  ;;  %v538_v63 = vld [vmem:[%s2522_s2 + $0x78] sm:$0xff]  ;;  %v539_v0 = vld [vmem:[%s2522_s2 + $0x80] sm:$0xff] }
  0x15   :  { %1901 = vmatprep.subr.bf16.mxu1 %v1900_v41  ;;  %v1916_v1 = vpack.c.bf16 %v520_v62, %v519_v61  ;;  %v540_v2 = vld [vmem:[%s2522_s2 + $0x88] sm:$0xff]  ;;  %v541_v4 = vld [vmem:[%s2522_s2 + $0x90] sm:$0xff]  ;;  %v542_v6 = vld [vmem:[%s2522_s2 + $0x98] sm:$0xff] }
  0x16   :  { %1774 = vmatmul.mubr.msk.f32.gmra.mrb[6].mxu1 %vm556_vm0, %v530_v39  ;;  %v1990_v5 = vld [vmem:[%s2520_s0 + $0x64] ss:$8 sps:$4 sm:$0xff]   ;;  %v1992_v9 = vld [vmem:[%s2520_s0 + $0x60] ss:$8 sps:$4 sm:$0xff]   ;;  %v545_v10 = vld [vmem:[%s2522_s2 + $0xb0] sm:$0xff] }
  0x17   :  { %1580 = vmatpush3.bf16.msra.mxu0 %v1967_v12  ;;  %1776 = vmatprep.mubr.msk.f32.mxu1 %vm556_vm0, %v531_v40  ;;  %v543_v7 = vld [vmem:[%s2522_s2 + $0xa0] sm:$0xff]  ;;  %v544_v8 = vld [vmem:[%s2522_s2 + $0xa8] sm:$0xff]  ;;  %v1993_v11 = vld [vmem:[%s2520_s0 + $0x74] ss:$8 sps:$4 sm:$0xff]  }
  0x18   :  { %1581 = vmatprep.subr.bf16.mxu0 %v1968_v13  ;;  %1903 = vmatpush3.bf16.msra.mxu1 %v1900_v41  ;;  %v546_v12 = vld [vmem:[%s2522_s2 + $0xb8] sm:$0xff]  ;;  %v547_v13 = vld [vmem:[%s2522_s2 + $0xc0] sm:$0xff]  ;;  %v552_v20 = vld [vmem:[%s2522_s2 + $0xe8] sm:$0xff] }
  0x19   :  { %1905 = vmatprep.subr.bf16.mxu1 %v1904_v47  ;;  %v551_v19 = vld [vmem:[%s2522_s2 + $0xe0] sm:$0xff]  ;;  %v1999_v22 = vld [vmem:[%s2520_s0 + $0x94] ss:$8 sps:$4 sm:$0xff]   ;;  %v2001_v23 = vld [vmem:[%s2520_s0 + $0x90] ss:$8 sps:$4 sm:$0xff]  }
  0x1a   :  { %1777 = vmatmul.mubr.msk.f32.gmra.mrb[8].mxu1 %vm556_vm0, %v532_v44  ;;  %v2004_v25 = vld [vmem:[%s2520_s0 + $0xa0] ss:$8 sps:$4 sm:$0xff]   ;;  %v2005_v26 = vld [vmem:[%s2520_s0 + $0xb4] ss:$8 sps:$4 sm:$0xff]   ;;  %v2007_v31 = vld [vmem:[%s2520_s0 + $0xb0] ss:$8 sps:$4 sm:$0xff]  }
  0x1b   :  { %1582 = vmatpush3.bf16.msra.mxu0 %v1969_v14  ;;  %1779 = vmatprep.mubr.msk.f32.mxu1 %vm556_vm0, %v533_v46  ;;  %v548_v14 = vld [vmem:[%s2522_s2 + $0xc8] sm:$0xff]  ;;  %v521_v27 = vld [vmem:[%s2523_s3 + $0x70] sm:$0xff]  ;;  %v522_v28 = vld [vmem:[%s2523_s3 + $0x78] sm:$0xff] }
  0x1c   :  { %1583 = vmatprep.subr.bf16.mxu0 %v1970_v15  ;;  %1907 = vmatpush3.bf16.msra.mxu1 %v1904_v47  ;;  %v1995_v15 = vld [vmem:[%s2520_s0 + $0x70] ss:$8 sps:$4 sm:$0xff]   ;;  %v1920_v30 = vpack.c.bf16 %v522_v28, %v521_v27  ;;  %v2010_v34 = vld [vmem:[%s2520_s0 + $0xc0] ss:$8 sps:$4 sm:$0xff]   ;;  %v2011_v35 = vld [vmem:[%s2520_s0 + $0xd4] ss:$8 sps:$4 sm:$0xff]  }
  0x1d   :  { %1909 = vmatprep.subr.bf16.mxu1 %v1908_v53  ;;  %v553_v29 = vld [vmem:[%s2522_s2 + $0xf0] sm:$0xff]  ;;  %v554_v32 = vld [vmem:[%s2522_s2 + $0xf8] sm:$0xff]  ;;  %v2014_v37 = vld [vmem:[%s2520_s0 + $0xe4] ss:$8 sps:$4 sm:$0xff]  }
  0x1e   :  { %1780 = vmatmul.mubr.msk.f32.gmra.mrb[10].mxu1 %vm556_vm0, %v534_v51  ;;  %v2016_v38 = vld [vmem:[%s2520_s0 + $0xe0] ss:$8 sps:$4 sm:$0xff]   ;;  %v2017_v39 = vld [vmem:[%s2520_s0 + $0xf4] ss:$8 sps:$4 sm:$0xff]   ;;  %v2019_v40 = vld [vmem:[%s2520_s0 + $0xf0] ss:$8 sps:$4 sm:$0xff]  }
  0x1f   :  { %1584 = vmatpush3.bf16.msra.mxu0 %v1971_v16  ;;  %1782 = vmatprep.mubr.msk.f32.mxu1 %vm556_vm0, %v535_v52  ;;  %v549_v16 = vld [vmem:[%s2522_s2 + $0xd0] sm:$0xff] }
  0x20   :  { %1911 = vmatpush3.bf16.msra.mxu1 %v1908_v53 }
  0x21   :  { %1913 = vmatprep.subr.bf16.mxu1 %v1912_v59 }
  0x22   :  { %379 = vmatmul.mubr.bf16.vlgmr.msra.gmra.mrb[0].mxu0 %v1972_v17  ;;  %1783 = vmatmul.mubr.msk.f32.gmra.mrb[12].mxu1 %vm556_vm0, %v536_v56  ;;  %v1996_v17 = vld [vmem:[%s2520_s0 + $0x84] ss:$8 sps:$4 sm:$0xff]  }
  0x23   :  { %386 = vmatprep.mubr.bf16.mxu0 %v1975_v18  ;;  %1785 = vmatprep.mubr.msk.f32.mxu1 %vm556_vm0, %v537_v58  ;;  %v550_v18 = vld [vmem:[%s2522_s2 + $0xd8] sm:$0xff] }
  0x24   :  { %1915 = vmatpush3.bf16.msra.mxu1 %v1912_v59 }
  0x25   :  { %1917 = vmatprep.subr.bf16.mxu1 %v1916_v1 }
  0x26   :  { %1786 = vmatmul.mubr.msk.f32.gmra.mrb[14].mxu1 %vm556_vm0, %v538_v63 }
  0x27   :  { %1788 = vmatprep.mubr.msk.f32.mxu1 %vm556_vm0, %v539_v0 }
  0x28   :  { %1919 = vmatpush3.bf16.msra.mxu1 %v1916_v1 }
  0x29   :  { %1921 = vmatprep.subr.bf16.mxu1 %v1920_v30 }
  0x2a   :  { %387 = vmatmul.mubr.bf16.gmra.mrb[4].mxu0 %v1977_v21  ;;  %1789 = vmatmul.mubr.msk.f32.gmra.mrb[16].mxu1 %vm556_vm0, %v540_v2  ;;  %v1998_v21 = vld [vmem:[%s2520_s0 + $0x80] ss:$8 sps:$4 sm:$0xff]  }
  0x2b   :  { %394 = vmatprep.mubr.bf16.mxu0 %v1978_v24  ;;  %1791 = vmatprep.mubr.msk.f32.mxu1 %vm556_vm0, %v541_v4  ;;  %v2002_v24 = vld [vmem:[%s2520_s0 + $0xa4] ss:$8 sps:$4 sm:$0xff]  }
  0x2c   :  { %1923 = vmatpush3.bf16.msra.mxu1 %v1920_v30 }
  0x2e   :  { %1792 = vmatmul.mubr.msk.f32.gmra.mrb[18].mxu1 %vm556_vm0, %v542_v6 }
  0x2f   :  { %1794 = vmatprep.mubr.msk.f32.mxu1 %vm556_vm0, %v543_v7 }
  0x32   :  { %395 = vmatmul.mubr.bf16.gmra.mrb[8].mxu0 %v1980_v33  ;;  %1795 = vmatmul.mubr.msk.f32.gmra.mrb[20].mxu1 %vm556_vm0, %v544_v8  ;;  %v2008_v33 = vld [vmem:[%s2520_s0 + $0xc4] ss:$8 sps:$4 sm:$0xff]  }
  0x33   :  { %402 = vmatprep.mubr.bf16.mxu0 %v1981_v36  ;;  %1797 = vmatprep.mubr.msk.f32.mxu1 %vm556_vm0, %v545_v10  ;;  %v2013_v36 = vld [vmem:[%s2520_s0 + $0xd0] ss:$8 sps:$4 sm:$0xff]  }
  0x36   :  { %1798 = vmatmul.mubr.msk.f32.gmra.mrb[22].mxu1 %vm556_vm0, %v546_v12 }
  0x37   :  { %1800 = vmatprep.mubr.msk.f32.mxu1 %vm556_vm0, %v547_v13 }
  0x3a   :  { %403 = vmatmul.mubr.bf16.gmra.mrb[12].mxu0 %v1983_v45  ;;  %1801 = vmatmul.mubr.msk.f32.gmra.mrb[24].mxu1 %vm556_vm0, %v548_v14 }
  0x3b   :  { %410 = vmatprep.mubr.bf16.mxu0 %v1984_v48  ;;  %1803 = vmatprep.mubr.msk.f32.mxu1 %vm556_vm0, %v549_v16 }
  0x3e   :  { %1804 = vmatmul.mubr.msk.f32.gmra.mrb[26].mxu1 %vm556_vm0, %v550_v18 }
  0x3f   :  { %1806 = vmatprep.mubr.msk.f32.mxu1 %vm556_vm0, %v551_v19 }
  0x42   :  { %411 = vmatmul.mubr.bf16.gmra.mrb[16].mxu0 %v1986_v57  ;;  %1807 = vmatmul.mubr.msk.f32.gmra.mrb[28].mxu1 %vm556_vm0, %v552_v20 }
  0x43   :  { %418 = vmatprep.mubr.bf16.mxu0 %v1987_v60  ;;  %1809 = vmatprep.mubr.msk.f32.mxu1 %vm556_vm0, %v553_v29 }
  0x46   :  { %1810 = vmatmul.mubr.msk.f32.gmra.mrb[30].mxu1 %vm556_vm0, %v554_v32 }
  0x4a   :  { %419 = vmatmul.mubr.bf16.gmra.mrb[20].mxu0 %v1989_v3 }
  0x4b   :  { %426 = vmatprep.mubr.bf16.mxu0 %v1990_v5 }
  0x52   :  { %427 = vmatmul.mubr.bf16.gmra.mrb[24].mxu0 %v1992_v9 }
  0x53   :  { %434 = vmatprep.mubr.bf16.mxu0 %v1993_v11 }
  0x5a   :  { %435 = vmatmul.mubr.bf16.gmra.mrb[28].mxu0 %v1995_v15 }
  0x5b   :  { %442 = vmatprep.mubr.bf16.mxu0 %v1996_v17 }
  0x62   :  { %443 = vmatmul.mubr.bf16.gmra.mrb[32].mxu0 %v1998_v21 }
  0x63   :  { %450 = vmatprep.mubr.bf16.mxu0 %v1999_v22 }
  0x6a   :  { %451 = vmatmul.mubr.bf16.gmra.mrb[36].mxu0 %v2001_v23 }
  0x6b   :  { %458 = vmatprep.mubr.bf16.mxu0 %v2002_v24 }
  0x72   :  { %459 = vmatmul.mubr.bf16.gmra.mrb[40].mxu0 %v2004_v25 }
  0x73   :  { %466 = vmatprep.mubr.bf16.mxu0 %v2005_v26 }
  0x7a   :  { %467 = vmatmul.mubr.bf16.gmra.mrb[44].mxu0 %v2007_v31 }
  0x7b   :  { %474 = vmatprep.mubr.bf16.mxu0 %v2008_v33 }
  0x82   :  { %475 = vmatmul.mubr.bf16.gmra.mrb[48].mxu0 %v2010_v34 }
  0x83   :  { %482 = vmatprep.mubr.bf16.mxu0 %v2011_v35 }
  0x8a   :  { %483 = vmatmul.mubr.bf16.gmra.mrb[52].mxu0 %v2013_v36 }
  0x8b   :  { %490 = vmatprep.mubr.bf16.mxu0 %v2014_v37 }
  0x92   :  { %491 = vmatmul.mubr.bf16.gmra.mrb[56].mxu0 %v2016_v38 }
  0x93   :  { %498 = vmatprep.mubr.bf16.mxu0 %v2017_v39 }
  0x9a   :  { %499 = vmatmul.mubr.bf16.gmra.mrb[60].mxu0 %v2019_v40 }
  0xf5   :  { %v1585_v41 = vpop.f32.mrb[0].mxu0 }
  0xf6   :  { %v1586_v42 = vpop.f32.mrb[1].mxu0 }
  0xf7   :  { %v1587_v43 = vadd.f32 %v1586_v42, %v1585_v41  ;;  %v1588_v44 = vpop.f32.mrb[2].mxu0 }
  0xf8   :  { %v1589_v45 = vpop.f32.mrb[3].mxu0 }
  0xf9   :  { %v1590_v46 = vadd.f32 %v1589_v45, %v1588_v44  ;;  %1844 = vmatprep.mubr.f32.mxu1 %v1587_v43 }
  0xfb   :  { %1845 = vmatmul.mubr.f32.vlgmr.msra.gmra.mrb[0].mxu1 %v1590_v46 }
  0xfd   :  { %v1591_v47 = vpop.f32.mrb[4].mxu0 }
  0xfe   :  { %v1592_v48 = vpop.f32.mrb[5].mxu0 }
  0xff   :  { %v1593_v49 = vadd.f32 %v1592_v48, %v1591_v47  ;;  %v1594_v50 = vpop.f32.mrb[6].mxu0 }
 0x100   :  { %v1595_v51 = vpop.f32.mrb[7].mxu0 }
 0x101   :  { %v1596_v52 = vadd.f32 %v1595_v51, %v1594_v50  ;;  %1847 = vmatprep.mubr.f32.mxu1 %v1593_v49 }
 0x103   :  { %1848 = vmatmul.mubr.f32.gmra.mrb[2].mxu1 %v1596_v52 }
 0x105   :  { %v1597_v53 = vpop.f32.mrb[8].mxu0 }
 0x106   :  { %v1598_v54 = vpop.f32.mrb[9].mxu0 }
 0x107   :  { %v1599_v55 = vadd.f32 %v1598_v54, %v1597_v53  ;;  %v1600_v56 = vpop.f32.mrb[10].mxu0 }
 0x108   :  { %v1601_v57 = vpop.f32.mrb[11].mxu0 }
 0x109   :  { %v1602_v58 = vadd.f32 %v1601_v57, %v1600_v56  ;;  %1850 = vmatprep.mubr.f32.mxu1 %v1599_v55 }
 0x10b   :  { %1851 = vmatmul.mubr.f32.gmra.mrb[4].mxu1 %v1602_v58 }
 0x10d   :  { %v1603_v59 = vpop.f32.mrb[12].mxu0 }
 0x10e   :  { %v1604_v60 = vpop.f32.mrb[13].mxu0 }
 0x10f   :  { %v1605_v61 = vadd.f32 %v1604_v60, %v1603_v59  ;;  %v1606_v62 = vpop.f32.mrb[14].mxu0 }
 0x110   :  { %v1607_v63 = vpop.f32.mrb[15].mxu0 }
 0x111   :  { %v1608_v0 = vadd.f32 %v1607_v63, %v1606_v62  ;;  %1853 = vmatprep.mubr.f32.mxu1 %v1605_v61 }
 0x113   :  { %1854 = vmatmul.mubr.f32.gmra.mrb[6].mxu1 %v1608_v0 }
 0x115   :  { %v1609_v1 = vpop.f32.mrb[16].mxu0 }
 0x116   :  { %v1610_v2 = vpop.f32.mrb[17].mxu0 }
 0x117   :  { %v1611_v3 = vadd.f32 %v1610_v2, %v1609_v1  ;;  %v1612_v4 = vpop.f32.mrb[18].mxu0 }
 0x118   :  { %v1613_v5 = vpop.f32.mrb[19].mxu0 }
 0x119   :  { %v1614_v6 = vadd.f32 %v1613_v5, %v1612_v4  ;;  %1856 = vmatprep.mubr.f32.mxu1 %v1611_v3 }
 0x11b   :  { %1857 = vmatmul.mubr.f32.gmra.mrb[8].mxu1 %v1614_v6 }
 0x11d   :  { %v1615_v7 = vpop.f32.mrb[20].mxu0 }
 0x11e   :  { %v1616_v8 = vpop.f32.mrb[21].mxu0 }
 0x11f   :  { %v1617_v9 = vadd.f32 %v1616_v8, %v1615_v7  ;;  %v1618_v10 = vpop.f32.mrb[22].mxu0 }
 0x120   :  { %v1619_v11 = vpop.f32.mrb[23].mxu0 }
 0x121   :  { %v1620_v12 = vadd.f32 %v1619_v11, %v1618_v10  ;;  %1859 = vmatprep.mubr.f32.mxu1 %v1617_v9  ;;  %v2386_v9 = vld [vmem:[%s2524_s5] ss:$0 sm:$0xff] }
 0x123   :  { %1860 = vmatmul.mubr.f32.gmra.mrb[10].mxu1 %v1620_v12 }
 0x125   :  { %v1621_v13 = vpop.f32.mrb[24].mxu0 }
 0x126   :  { %v1622_v14 = vpop.f32.mrb[25].mxu0 }
 0x127   :  { %v1623_v15 = vadd.f32 %v1622_v14, %v1621_v13  ;;  %v1624_v16 = vpop.f32.mrb[26].mxu0 }
 0x128   :  { %v1625_v17 = vpop.f32.mrb[27].mxu0 }
 0x129   :  { %v1626_v18 = vadd.f32 %v1625_v17, %v1624_v16  ;;  %1862 = vmatprep.mubr.f32.mxu1 %v1623_v15 }
 0x12b   :  { %1863 = vmatmul.mubr.f32.gmra.mrb[12].mxu1 %v1626_v18 }
 0x12d   :  { %v1627_v19 = vpop.f32.mrb[28].mxu0 }
 0x12e   :  { %v1628_v20 = vpop.f32.mrb[29].mxu0 }
 0x12f   :  { %v1629_v21 = vadd.f32 %v1628_v20, %v1627_v19  ;;  %v1630_v22 = vpop.f32.mrb[30].mxu0 }
 0x130   :  { %v1631_v23 = vpop.f32.mrb[31].mxu0 }
 0x131   :  { %v1632_v24 = vadd.f32 %v1631_v23, %v1630_v22  ;;  %1865 = vmatprep.mubr.f32.mxu1 %v1629_v21 }
 0x133   :  { %1866 = vmatmul.mubr.f32.gmra.mrb[14].mxu1 %v1632_v24 }
 0x135   :  { %v1633_v25 = vpop.f32.mrb[32].mxu0 }
 0x136   :  { %v1634_v26 = vpop.f32.mrb[33].mxu0 }
 0x137   :  { %v1635_v27 = vadd.f32 %v1634_v26, %v1633_v25  ;;  %v1636_v28 = vpop.f32.mrb[34].mxu0 }
 0x138   :  { %v1637_v29 = vpop.f32.mrb[35].mxu0 }
 0x139   :  { %v1638_v30 = vadd.f32 %v1637_v29, %v1636_v28  ;;  %1868 = vmatprep.mubr.f32.mxu1 %v1635_v27 }
 0x13b   :  { %1869 = vmatmul.mubr.f32.gmra.mrb[16].mxu1 %v1638_v30 }
 0x13d   :  { %v1639_v31 = vpop.f32.mrb[36].mxu0 }
 0x13e   :  { %v1640_v32 = vpop.f32.mrb[37].mxu0 }
 0x13f   :  { %v1641_v33 = vadd.f32 %v1640_v32, %v1639_v31  ;;  %v1642_v34 = vpop.f32.mrb[38].mxu0 }
 0x140   :  { %v1643_v35 = vpop.f32.mrb[39].mxu0 }
 0x141   :  { %v1644_v36 = vadd.f32 %v1643_v35, %v1642_v34  ;;  %1871 = vmatprep.mubr.f32.mxu1 %v1641_v33 }
 0x143   :  { %1872 = vmatmul.mubr.f32.gmra.mrb[18].mxu1 %v1644_v36 }
 0x145   :  { %v1645_v37 = vpop.f32.mrb[40].mxu0 }
 0x146   :  { %v1646_v38 = vpop.f32.mrb[41].mxu0 }
 0x147   :  { %v1647_v39 = vadd.f32 %v1646_v38, %v1645_v37  ;;  %v1648_v40 = vpop.f32.mrb[42].mxu0 }
 0x148   :  { %v1649_v41 = vpop.f32.mrb[43].mxu0 }
 0x149   :  { %v1650_v42 = vadd.f32 %v1649_v41, %v1648_v40  ;;  %1874 = vmatprep.mubr.f32.mxu1 %v1647_v39 }
 0x14b   :  { %1875 = vmatmul.mubr.f32.gmra.mrb[20].mxu1 %v1650_v42 }
 0x14d   :  { %v1651_v43 = vpop.f32.mrb[44].mxu0 }
 0x14e   :  { %v1652_v44 = vpop.f32.mrb[45].mxu0 }
 0x14f   :  { %v1653_v45 = vadd.f32 %v1652_v44, %v1651_v43  ;;  %v1654_v46 = vpop.f32.mrb[46].mxu0 }
 0x150   :  { %v1655_v47 = vpop.f32.mrb[47].mxu0 }
 0x151   :  { %v1656_v48 = vadd.f32 %v1655_v47, %v1654_v46  ;;  %1877 = vmatprep.mubr.f32.mxu1 %v1653_v45 }
 0x153   :  { %1878 = vmatmul.mubr.f32.gmra.mrb[22].mxu1 %v1656_v48 }
 0x155   :  { %v1657_v49 = vpop.f32.mrb[48].mxu0 }
 0x156   :  { %v1658_v50 = vpop.f32.mrb[49].mxu0 }
 0x157   :  { %v1659_v51 = vadd.f32 %v1658_v50, %v1657_v49  ;;  %v1660_v52 = vpop.f32.mrb[50].mxu0 }
 0x158   :  { %v1661_v53 = vpop.f32.mrb[51].mxu0 }
 0x159   :  { %v1662_v54 = vadd.f32 %v1661_v53, %v1660_v52  ;;  %1880 = vmatprep.mubr.f32.mxu1 %v1659_v51 }
 0x15b   :  { %1881 = vmatmul.mubr.f32.gmra.mrb[24].mxu1 %v1662_v54 }
 0x15d   :  { %v1663_v55 = vpop.f32.mrb[52].mxu0 }
 0x15e   :  { %v1664_v56 = vpop.f32.mrb[53].mxu0 }
 0x15f   :  { %v1665_v57 = vadd.f32 %v1664_v56, %v1663_v55  ;;  %v1666_v58 = vpop.f32.mrb[54].mxu0 }
 0x160   :  { %v1667_v59 = vpop.f32.mrb[55].mxu0 }
 0x161   :  { %v1668_v60 = vadd.f32 %v1667_v59, %v1666_v58  ;;  %1883 = vmatprep.mubr.f32.mxu1 %v1665_v57 }
 0x163   :  { %1884 = vmatmul.mubr.f32.gmra.mrb[26].mxu1 %v1668_v60 }
 0x165   :  { %v1669_v61 = vpop.f32.mrb[56].mxu0 }
 0x166   :  { %v1670_v62 = vpop.f32.mrb[57].mxu0 }
 0x167   :  { %v1671_v63 = vadd.f32 %v1670_v62, %v1669_v61  ;;  %v1672_v0 = vpop.f32.mrb[58].mxu0 }
 0x168   :  { %v1673_v1 = vpop.f32.mrb[59].mxu0 }
 0x169   :  { %v1674_v2 = vadd.f32 %v1673_v1, %v1672_v0  ;;  %1886 = vmatprep.mubr.f32.mxu1 %v1671_v63 }
 0x16b   :  { %1887 = vmatmul.mubr.f32.gmra.mrb[28].mxu1 %v1674_v2 }
 0x16d   :  { %v1675_v3 = vpop.f32.mrb[60].mxu0 }
 0x16e   :  { %v1676_v4 = vpop.f32.mrb[61].mxu0 }
 0x16f   :  { %v1677_v5 = vadd.f32 %v1676_v4, %v1675_v3  ;;  %v1678_v6 = vpop.f32.mrb[62].mxu0 }
 0x170   :  { %v1679_v7 = vpop.f32.mrb[63].mxu0 }
 0x171   :  { %v1680_v8 = vadd.f32 %v1679_v7, %v1678_v6  ;;  %1889 = vmatprep.mubr.f32.mxu1 %v1677_v5 }
 0x173   :  { %1890 = vmatmul.mubr.f32.gmra.mrb[30].mxu1 %v1680_v8 }
 0x1ce   :  { %v1846_v10 = vpop.f32.mrb[0].mxu1 }
 0x1cf   :  { %v1111_v11 = vadd.f32 %v1846_v10, %v2386_v9  ;;  %v944_v12 = vpop.f32.mrb[1].mxu1 }
 0x1d0   :  { %v1110_v13 = vadd.f32 %v2386_v9, %v944_v12 }
 0x1d1   :  { %1143 = vst [vmem:[%s2525_s6 + $0x8] sm:$0xff] %v1111_v11  ;;  %v1407_v14 = vmul.f32 %v1111_v11, %v1111_v11 }
 0x1d2   :  { %1142 = vst [vmem:[%s2525_s6] sm:$0xff] %v1110_v13  ;;  %v1369_v15 = vadd.f32 %v1111_v11, %v1110_v13  ;;  %v1406_v16 = vmul.f32 %v1110_v13, %v1110_v13 }
 0x1d4   :  { %v1438_v17 = vadd.f32 %v1407_v14, %v1406_v16 }
 0x1d6   :  { %v1849_v18 = vpop.f32.mrb[2].mxu1 }
 0x1d7   :  { %v1113_v19 = vadd.f32 %v1849_v18, %v2386_v9  ;;  %v954_v20 = vpop.f32.mrb[3].mxu1 }
 0x1d8   :  { %v1112_v21 = vadd.f32 %v2386_v9, %v954_v20 }
 0x1d9   :  { %1145 = vst [vmem:[%s2525_s6 + $0x18] sm:$0xff] %v1113_v19  ;;  %v1409_v24 = vmul.f32 %v1113_v19, %v1113_v19 }
 0x1da   :  { %1144 = vst [vmem:[%s2525_s6 + $0x10] sm:$0xff] %v1112_v21  ;;  %v1370_v22 = vadd.f32 %v1369_v15, %v1112_v21  ;;  %v1408_v23 = vmul.f32 %v1112_v21, %v1112_v21 }
 0x1dc   :  { %v1439_v25 = vadd.f32 %v1438_v17, %v1408_v23  ;;  %v1371_v26 = vadd.f32 %v1370_v22, %v1113_v19 }
 0x1de   :  { %v1852_v27 = vpop.f32.mrb[4].mxu1  ;;  %v1440_v28 = vadd.f32 %v1439_v25, %v1409_v24 }
 0x1df   :  { %v1115_v29 = vadd.f32 %v1852_v27, %v2386_v9  ;;  %v964_v30 = vpop.f32.mrb[5].mxu1 }
 0x1e0   :  { %v1114_v31 = vadd.f32 %v2386_v9, %v964_v30 }
 0x1e1   :  { %1147 = vst [vmem:[%s2525_s6 + $0x28] sm:$0xff] %v1115_v29  ;;  %v1411_v34 = vmul.f32 %v1115_v29, %v1115_v29 }
 0x1e2   :  { %1146 = vst [vmem:[%s2525_s6 + $0x20] sm:$0xff] %v1114_v31  ;;  %v1372_v32 = vadd.f32 %v1371_v26, %v1114_v31  ;;  %v1410_v33 = vmul.f32 %v1114_v31, %v1114_v31 }
 0x1e4   :  { %v1441_v35 = vadd.f32 %v1440_v28, %v1410_v33  ;;  %v1373_v36 = vadd.f32 %v1372_v32, %v1115_v29 }
 0x1e6   :  { %v1855_v37 = vpop.f32.mrb[6].mxu1  ;;  %v1442_v38 = vadd.f32 %v1441_v35, %v1411_v34 }
 0x1e7   :  { %v1117_v39 = vadd.f32 %v1855_v37, %v2386_v9  ;;  %v974_v40 = vpop.f32.mrb[7].mxu1 }
 0x1e8   :  { %v1116_v41 = vadd.f32 %v2386_v9, %v974_v40 }
 0x1e9   :  { %1149 = vst [vmem:[%s2525_s6 + $0x38] sm:$0xff] %v1117_v39  ;;  %v1413_v44 = vmul.f32 %v1117_v39, %v1117_v39 }
 0x1ea   :  { %1148 = vst [vmem:[%s2525_s6 + $0x30] sm:$0xff] %v1116_v41  ;;  %v1374_v42 = vadd.f32 %v1373_v36, %v1116_v41  ;;  %v1412_v43 = vmul.f32 %v1116_v41, %v1116_v41 }
 0x1ec   :  { %v1443_v45 = vadd.f32 %v1442_v38, %v1412_v43  ;;  %v1375_v46 = vadd.f32 %v1374_v42, %v1117_v39 }
 0x1ee   :  { %v1858_v47 = vpop.f32.mrb[8].mxu1  ;;  %v1444_v48 = vadd.f32 %v1443_v45, %v1413_v44 }
 0x1ef   :  { %v1119_v49 = vadd.f32 %v1858_v47, %v2386_v9  ;;  %v984_v50 = vpop.f32.mrb[9].mxu1 }
 0x1f0   :  { %v1118_v51 = vadd.f32 %v2386_v9, %v984_v50 }
 0x1f1   :  { %1151 = vst [vmem:[%s2525_s6 + $0x48] sm:$0xff] %v1119_v49  ;;  %v1415_v54 = vmul.f32 %v1119_v49, %v1119_v49 }
 0x1f2   :  { %1150 = vst [vmem:[%s2525_s6 + $0x40] sm:$0xff] %v1118_v51  ;;  %v1376_v52 = vadd.f32 %v1375_v46, %v1118_v51  ;;  %v1414_v53 = vmul.f32 %v1118_v51, %v1118_v51 }
 0x1f4   :  { %v1445_v55 = vadd.f32 %v1444_v48, %v1414_v53  ;;  %v1377_v56 = vadd.f32 %v1376_v52, %v1119_v49 }
 0x1f6   :  { %v1861_v57 = vpop.f32.mrb[10].mxu1  ;;  %v1446_v58 = vadd.f32 %v1445_v55, %v1415_v54 }
 0x1f7   :  { %v1121_v59 = vadd.f32 %v1861_v57, %v2386_v9  ;;  %v994_v60 = vpop.f32.mrb[11].mxu1 }
 0x1f8   :  { %v1120_v61 = vadd.f32 %v2386_v9, %v994_v60 }
 0x1f9   :  { %1153 = vst [vmem:[%s2525_s6 + $0x58] sm:$0xff] %v1121_v59  ;;  %v1417_v0 = vmul.f32 %v1121_v59, %v1121_v59 }
 0x1fa   :  { %1152 = vst [vmem:[%s2525_s6 + $0x50] sm:$0xff] %v1120_v61  ;;  %v1378_v62 = vadd.f32 %v1377_v56, %v1120_v61  ;;  %v1416_v63 = vmul.f32 %v1120_v61, %v1120_v61 }
 0x1fc   :  { %v1447_v1 = vadd.f32 %v1446_v58, %v1416_v63  ;;  %v1379_v2 = vadd.f32 %v1378_v62, %v1121_v59 }
 0x1fe   :  { %v1864_v3 = vpop.f32.mrb[12].mxu1  ;;  %v1448_v4 = vadd.f32 %v1447_v1, %v1417_v0 }
 0x1ff   :  { %v1123_v5 = vadd.f32 %v1864_v3, %v2386_v9  ;;  %v1004_v6 = vpop.f32.mrb[13].mxu1 }
 0x200   :  { %v1122_v7 = vadd.f32 %v2386_v9, %v1004_v6 }
 0x201   :  { %1155 = vst [vmem:[%s2525_s6 + $0x68] sm:$0xff] %v1123_v5  ;;  %v1419_v11 = vmul.f32 %v1123_v5, %v1123_v5 }
 0x202   :  { %1154 = vst [vmem:[%s2525_s6 + $0x60] sm:$0xff] %v1122_v7  ;;  %v1380_v8 = vadd.f32 %v1379_v2, %v1122_v7  ;;  %v1418_v10 = vmul.f32 %v1122_v7, %v1122_v7 }
 0x204   :  { %v1449_v12 = vadd.f32 %v1448_v4, %v1418_v10  ;;  %v1381_v13 = vadd.f32 %v1380_v8, %v1123_v5 }
 0x206   :  { %v1867_v14 = vpop.f32.mrb[14].mxu1  ;;  %v1450_v15 = vadd.f32 %v1449_v12, %v1419_v11 }
 0x207   :  { %v1125_v16 = vadd.f32 %v1867_v14, %v2386_v9  ;;  %v1014_v17 = vpop.f32.mrb[15].mxu1 }
 0x208   :  { %v1124_v18 = vadd.f32 %v2386_v9, %v1014_v17 }
 0x209   :  { %1157 = vst [vmem:[%s2525_s6 + $0x78] sm:$0xff] %v1125_v16  ;;  %v1421_v21 = vmul.f32 %v1125_v16, %v1125_v16 }
 0x20a   :  { %1156 = vst [vmem:[%s2525_s6 + $0x70] sm:$0xff] %v1124_v18  ;;  %v1382_v19 = vadd.f32 %v1381_v13, %v1124_v18  ;;  %v1420_v20 = vmul.f32 %v1124_v18, %v1124_v18 }
 0x20c   :  { %v1451_v22 = vadd.f32 %v1450_v15, %v1420_v20  ;;  %v1383_v23 = vadd.f32 %v1382_v19, %v1125_v16 }
 0x20e   :  { %v1870_v24 = vpop.f32.mrb[16].mxu1  ;;  %v1452_v25 = vadd.f32 %v1451_v22, %v1421_v21 }
 0x20f   :  { %v1127_v26 = vadd.f32 %v1870_v24, %v2386_v9  ;;  %v1024_v27 = vpop.f32.mrb[17].mxu1 }
 0x210   :  { %v1126_v28 = vadd.f32 %v2386_v9, %v1024_v27 }
 0x211   :  { %1159 = vst [vmem:[%s2525_s6 + $0x88] sm:$0xff] %v1127_v26  ;;  %v1423_v31 = vmul.f32 %v1127_v26, %v1127_v26 }
 0x212   :  { %1158 = vst [vmem:[%s2525_s6 + $0x80] sm:$0xff] %v1126_v28  ;;  %v1384_v29 = vadd.f32 %v1383_v23, %v1126_v28  ;;  %v1422_v30 = vmul.f32 %v1126_v28, %v1126_v28 }
 0x214   :  { %v1453_v32 = vadd.f32 %v1452_v25, %v1422_v30  ;;  %v1385_v33 = vadd.f32 %v1384_v29, %v1127_v26 }
 0x216   :  { %v1873_v34 = vpop.f32.mrb[18].mxu1  ;;  %v1454_v35 = vadd.f32 %v1453_v32, %v1423_v31 }
 0x217   :  { %v1129_v36 = vadd.f32 %v1873_v34, %v2386_v9  ;;  %v1034_v37 = vpop.f32.mrb[19].mxu1 }
 0x218   :  { %v1128_v38 = vadd.f32 %v2386_v9, %v1034_v37 }
 0x219   :  { %1161 = vst [vmem:[%s2525_s6 + $0x98] sm:$0xff] %v1129_v36  ;;  %v1425_v41 = vmul.f32 %v1129_v36, %v1129_v36 }
 0x21a   :  { %1160 = vst [vmem:[%s2525_s6 + $0x90] sm:$0xff] %v1128_v38  ;;  %v1386_v39 = vadd.f32 %v1385_v33, %v1128_v38  ;;  %v1424_v40 = vmul.f32 %v1128_v38, %v1128_v38 }
 0x21c   :  { %v1455_v42 = vadd.f32 %v1454_v35, %v1424_v40  ;;  %v1387_v43 = vadd.f32 %v1386_v39, %v1129_v36 }
 0x21e   :  { %v1876_v44 = vpop.f32.mrb[20].mxu1  ;;  %v1456_v45 = vadd.f32 %v1455_v42, %v1425_v41 }
 0x21f   :  { %v1131_v46 = vadd.f32 %v1876_v44, %v2386_v9  ;;  %v1044_v47 = vpop.f32.mrb[21].mxu1 }
 0x220   :  { %v1130_v48 = vadd.f32 %v2386_v9, %v1044_v47 }
 0x221   :  { %1163 = vst [vmem:[%s2525_s6 + $0xa8] sm:$0xff] %v1131_v46  ;;  %v1427_v51 = vmul.f32 %v1131_v46, %v1131_v46 }
 0x222   :  { %1162 = vst [vmem:[%s2525_s6 + $0xa0] sm:$0xff] %v1130_v48  ;;  %v1388_v49 = vadd.f32 %v1387_v43, %v1130_v48  ;;  %v1426_v50 = vmul.f32 %v1130_v48, %v1130_v48 }
 0x224   :  { %v1457_v52 = vadd.f32 %v1456_v45, %v1426_v50  ;;  %v1389_v53 = vadd.f32 %v1388_v49, %v1131_v46  ;;  %v1175_v45 = vlaneseq }
 0x226   :  { %v1879_v54 = vpop.f32.mrb[22].mxu1  ;;  %v1458_v55 = vadd.f32 %v1457_v52, %v1427_v51  ;;  %v1176_v49 = vshrl.u32 %v1175_v45, 7 }
 0x227   :  { %v1133_v56 = vadd.f32 %v1879_v54, %v2386_v9  ;;  %v1054_v57 = vpop.f32.mrb[23].mxu1 }
 0x228   :  { %v1132_v58 = vadd.f32 %v2386_v9, %v1054_v57  ;;  %vm1476_vm1 = vcmp.eq.s32.totalorder %v1176_v49, 1  ;;  %vm1475_vm2 = vcmp.eq.s32.totalorder %v1176_v49, 0 }
 0x229   :  { %1165 = vst [vmem:[%s2525_s6 + $0xb8] sm:$0xff] %v1133_v56  ;;  %v1429_v61 = vmul.f32 %v1133_v56, %v1133_v56 }
 0x22a   :  { %1164 = vst [vmem:[%s2525_s6 + $0xb0] sm:$0xff] %v1132_v58  ;;  %v1390_v59 = vadd.f32 %v1389_v53, %v1132_v58  ;;  %v1428_v60 = vmul.f32 %v1132_v58, %v1132_v58 }
 0x22c   :  { %v1459_v62 = vadd.f32 %v1458_v55, %v1428_v60  ;;  %v1391_v63 = vadd.f32 %v1390_v59, %v1133_v56 }
 0x22e   :  { %v1882_v0 = vpop.f32.mrb[24].mxu1  ;;  %v1460_v1 = vadd.f32 %v1459_v62, %v1429_v61 }
 0x22f   :  { %v1135_v2 = vadd.f32 %v1882_v0, %v2386_v9  ;;  %v1064_v3 = vpop.f32.mrb[25].mxu1 }
 0x230   :  { %v1134_v4 = vadd.f32 %v2386_v9, %v1064_v3 }
 0x231   :  { %1167 = vst [vmem:[%s2525_s6 + $0xc8] sm:$0xff] %v1135_v2  ;;  %v1431_v7 = vmul.f32 %v1135_v2, %v1135_v2 }
 0x232   :  { %1166 = vst [vmem:[%s2525_s6 + $0xc0] sm:$0xff] %v1134_v4  ;;  %v1392_v5 = vadd.f32 %v1391_v63, %v1134_v4  ;;  %v1430_v6 = vmul.f32 %v1134_v4, %v1134_v4 }
 0x234   :  { %v1461_v8 = vadd.f32 %v1460_v1, %v1430_v6  ;;  %v1393_v10 = vadd.f32 %v1392_v5, %v1135_v2 }
 0x236   :  { %v1885_v11 = vpop.f32.mrb[26].mxu1  ;;  %v1462_v12 = vadd.f32 %v1461_v8, %v1431_v7 }
 0x237   :  { %v1137_v13 = vadd.f32 %v1885_v11, %v2386_v9  ;;  %v1074_v14 = vpop.f32.mrb[27].mxu1 }
 0x238   :  { %v1136_v15 = vadd.f32 %v2386_v9, %v1074_v14 }
 0x239   :  { %1169 = vst [vmem:[%s2525_s6 + $0xd8] sm:$0xff] %v1137_v13  ;;  %v1433_v18 = vmul.f32 %v1137_v13, %v1137_v13 }
 0x23a   :  { %1168 = vst [vmem:[%s2525_s6 + $0xd0] sm:$0xff] %v1136_v15  ;;  %v1394_v16 = vadd.f32 %v1393_v10, %v1136_v15  ;;  %v1432_v17 = vmul.f32 %v1136_v15, %v1136_v15 }
 0x23c   :  { %v1463_v19 = vadd.f32 %v1462_v12, %v1432_v17  ;;  %v1395_v20 = vadd.f32 %v1394_v16, %v1137_v13 }
 0x23e   :  { %v1888_v21 = vpop.f32.mrb[28].mxu1  ;;  %v1464_v22 = vadd.f32 %v1463_v19, %v1433_v18 }
 0x23f   :  { %v1139_v23 = vadd.f32 %v1888_v21, %v2386_v9  ;;  %v1084_v24 = vpop.f32.mrb[29].mxu1 }
 0x240   :  { %v1138_v25 = vadd.f32 %v2386_v9, %v1084_v24 }
 0x241   :  { %1171 = vst [vmem:[%s2525_s6 + $0xe8] sm:$0xff] %v1139_v23  ;;  %v1435_v28 = vmul.f32 %v1139_v23, %v1139_v23 }
 0x242   :  { %1170 = vst [vmem:[%s2525_s6 + $0xe0] sm:$0xff] %v1138_v25  ;;  %v1396_v26 = vadd.f32 %v1395_v20, %v1138_v25  ;;  %v1434_v27 = vmul.f32 %v1138_v25, %v1138_v25 }
 0x244   :  { %v1465_v29 = vadd.f32 %v1464_v22, %v1434_v27  ;;  %v1397_v30 = vadd.f32 %v1396_v26, %v1139_v23 }
 0x246   :  { %v1891_v31 = vpop.f32.mrb[30].mxu1  ;;  %v1466_v32 = vadd.f32 %v1465_v29, %v1435_v28 }
 0x247   :  { %v1141_v33 = vadd.f32 %v1891_v31, %v2386_v9  ;;  %v1094_v34 = vpop.f32.mrb[31].mxu1 }
 0x248   :  { %v1140_v35 = vadd.f32 %v2386_v9, %v1094_v34 }
 0x249   :  { %1173 = vst [vmem:[%s2525_s6 + $0xf8] sm:$0xff] %v1141_v33  ;;  %v1437_v38 = vmul.f32 %v1141_v33, %v1141_v33 }
 0x24a   :  { %1172 = vst [vmem:[%s2525_s6 + $0xf0] sm:$0xff] %v1140_v35  ;;  %v1398_v36 = vadd.f32 %v1397_v30, %v1140_v35  ;;  %v1436_v37 = vmul.f32 %v1140_v35, %v1140_v35 }
 0x24c   :  { %v1399_v39 = vadd.f32 %v1398_v36, %v1141_v33  ;;  %v1467_v40 = vadd.f32 %v1466_v32, %v1436_v37 }
 0x24e   :  { %v1400_v41 = vrot.slane %v1399_v39, 4  ;;  %v1468_v42 = vadd.f32 %v1467_v40, %v1437_v38 }
 0x250   :  { %v1401_v43 = vadd.f32 %v1400_v41, %v1399_v39  ;;  %v1469_v44 = vrot.slane %v1468_v42, 4 }
 0x252   :  { %v1402_v46 = vrot.slane %v1401_v43, 2  ;;  %v1470_v9 = vadd.f32 %v1469_v44, %v1468_v42 }
 0x254   :  { %v1403_v47 = vadd.f32 %v1402_v46, %v1401_v43  ;;  %v1471_v48 = vrot.slane %v1470_v9, 2 }
 0x256   :  { %v1472_v50 = vadd.f32 %v1471_v48, %v1470_v9  ;;  %v1404_v51 = vrot.slane %v1403_v47, 1 }
 0x258   :  { %v1473_v52 = vrot.slane %v1472_v50, 1  ;;  %v1405_v54 = vadd.f32 %v1404_v51, %v1403_v47 }
 0x25a   :  { %v1474_v53 = vadd.f32 %v1473_v52, %v1472_v50 }
 0x25c   :  { %v1477_v55 = vsel %vm1476_vm1, %v1474_v53, 0.0 }
 0x25d   :  { %v1478_v56 = vsel %vm1475_vm2, %v1405_v54, %v1477_v55 }
 0x25e   :  { %1479 = vst [vmem:[%s2526_s7] sm:$0xff] %v1478_v56 }

</bundles_post_ra>
